<compile_context>
chip_gen: v5e
topology: v5e:2x2
jax: 0.10.0
libtpu: 0.0.40
codegen_flags: <defaults>
</compile_context>

<pallas_src>
import functools

import numpy as np
import jax
import jax.numpy as jnp
from jax.experimental import pallas as pl
from jax.experimental.pallas import tpu as pltpu

# Align matmul precision between the in-kernel MXU dots and the XLA reference.
jax.config.update("jax_default_matmul_precision", "highest")

INV_LRELU_ALPHA = 0.9    # InvLeakyRelu alpha (activation='lrelu')
NET_LRELU_SLOPE = 0.01   # LeakyReLU slope inside the parameter template (assumed)


def _softplus(x):
    return jnp.maximum(x, 0.0) + jnp.log(1.0 + jnp.exp(-jnp.abs(x)))


def _logsumexp_list(terms):
    m = terms[0]
    for t in terms[1:]:
        m = jnp.maximum(m, t)
    s = jnp.zeros_like(m)
    for t in terms:
        s = s + jnp.exp(t - m)
    return m + jnp.log(s)


# ----------------------------------------------------------------------------
# Pallas kernel: all n_flows blocks, state carried in VMEM scratch
# ----------------------------------------------------------------------------
def fused_flow_kernel(x_ref, scale_ref, loc_ref, mask_ref,
                      w_in_ref, b_in_ref, w_res_ref, b_res_ref,
                      w_out_ref, b_out_ref,
                      h_ref, ld_ref, g_scr, ld_scr,
                      *, depth, n_comp, C):
    f = pl.program_id(1)

    @pl.when(f == 0)
    def _():
        g_scr[...] = x_ref[...]
        ld_scr[...] = jnp.zeros_like(ld_scr)

    g = g_scr[...]                                          # (TB, C) carried state

    # --- ActNorm (shuffle-folded scale/loc; constant logdet added on host) ---
    a = scale_ref[0] * (g + loc_ref[0])
    # --- InvLeakyRelu (contributes 0 to logdet, per the reference source) ----
    b = jnp.where(a >= 0.0, a, INV_LRELU_ALPHA * a)

    # --- MixCDFParameterTemplate on the conditioner half ---------------------
    # The half-split is folded into w_in (zero rows at transformed channels).
    z = jnp.dot(b, w_in_ref[0], preferred_element_type=jnp.float32) + b_in_ref[0]
    z = jnp.where(z >= 0.0, z, NET_LRELU_SLOPE * z)
    for d in range(depth):
        r = jnp.dot(z, w_res_ref[0, d], preferred_element_type=jnp.float32)
        r = r + b_res_ref[0, d]
        r = jnp.where(r >= 0.0, r, NET_LRELU_SLOPE * r)
        z = z + r
    # One packed conv_out for s, t and the K mixture parameter groups; columns
    # are pre-scattered to the (shuffle-folded) transformed channel positions.
    out = jnp.dot(z, w_out_ref[0], preferred_element_type=jnp.float32) + b_out_ref[0]

    K = n_comp
    s = jnp.tanh(out[:, 0:C])
    t = out[:, C:2 * C]
    logits = [out[:, (2 + m) * C:(3 + m) * C] for m in range(K)]
    means = [out[:, (2 + K + m) * C:(3 + K + m) * C] for m in range(K)]
    logsc = [out[:, (2 + 2 * K + m) * C:(3 + 2 * K + m) * C] for m in range(K)]

    # Mixture-of-logistics logCDF / logPDF of the (full-width) activation b.
    log_norm = _logsumexp_list(logits)
    log_cdf_terms, log_pdf_terms = [], []
    for m in range(K):
        lw = logits[m] - log_norm                           # log softmax weight
        zm = (b - means[m]) * jnp.exp(-logsc[m])
        sp = _softplus(-zm)
        log_cdf_terms.append(lw - sp)                       # + log sigmoid(zm)
        log_pdf_terms.append(lw - zm - logsc[m] - 2.0 * sp)
    log_cdf = _logsumexp_list(log_cdf_terms)
    log_pdf = _logsumexp_list(log_pdf_terms)

    # y2 = exp(MixLogCDF); scale = Inverse(FLowSigmoid) => logit + its logdet.
    y2 = jnp.exp(log_cdf)
    y2l = -jnp.log(1.0 / y2 - 1.0)
    scale_ld = -jnp.log(y2) - jnp.log(1.0 - y2)
    y2o = y2l * jnp.exp(s) + t

    ld_elem = log_pdf + s + scale_ld
    maskv = mask_ref[0] + jnp.zeros_like(g)                 # (TB, C) in {0,1}
    transformed = maskv > 0.5

    g_new = jnp.where(transformed, y2o, b)
    new_ld = ld_scr[...] + jnp.sum(
        jnp.where(transformed, ld_elem, 0.0), axis=1, keepdims=True)

    g_scr[...] = g_new
    ld_scr[...] = new_ld

    @pl.when(f == pl.num_programs(1) - 1)
    def _():
        h_ref[...] = g_new
        ld_ref[...] = new_ld


def fused_flow_call(x, fp, *, depth, n_comp, tb):
    B, C = x.shape
    n_flows = fp["w_in"].shape[0]
    hid = fp["w_in"].shape[-1]
    PC = fp["w_out"].shape[-1]
    assert B % tb == 0
    grid = (B // tb, n_flows)

    def flow_idx3(b, f):
        return (f, 0, 0)

    def flow_idx4(b, f):
        return (f, 0, 0, 0)

    grid_spec = pltpu.PrefetchScalarGridSpec(
        num_scalar_prefetch=0,
        grid=grid,
        in_specs=[
            pl.BlockSpec((tb, C), lambda b, f: (b, 0)),        # x
            pl.BlockSpec((1, 1, C), flow_idx3),                # actnorm scale
            pl.BlockSpec((1, 1, C), flow_idx3),                # actnorm loc
            pl.BlockSpec((1, 1, C), flow_idx3),                # transformed mask
            pl.BlockSpec((1, C, hid), flow_idx3),              # w_in (scattered)
            pl.BlockSpec((1, 1, hid), flow_idx3),              # b_in
            pl.BlockSpec((1, depth, hid, hid), flow_idx4),     # w_res
            pl.BlockSpec((1, depth, 1, hid), flow_idx4),       # b_res
            pl.BlockSpec((1, hid, PC), flow_idx3),             # w_out (packed)
            pl.BlockSpec((1, 1, PC), flow_idx3),               # b_out
        ],
        out_specs=[
            pl.BlockSpec((tb, C), lambda b, f: (b, 0)),        # h (storage order)
            pl.BlockSpec((tb, 1), lambda b, f: (b, 0)),        # logdet
        ],
        scratch_shapes=[
            pltpu.VMEM((tb, C), jnp.float32),
            pltpu.VMEM((tb, 1), jnp.float32),
        ],
    )
    kern = functools.partial(fused_flow_kernel, depth=depth, n_comp=n_comp, C=C)
    h, ld = pl.pallas_call(
        kern,
        out_shape=(jax.ShapeDtypeStruct((B, C), jnp.float32),
                   jax.ShapeDtypeStruct((B, 1), jnp.float32)),
        grid_spec=grid_spec,
        compiler_params=pltpu.CompilerParams(
            dimension_semantics=("parallel", "arbitrary"),
            vmem_limit_bytes=32 * 1024 * 1024),
    )(x, fp["scale"], fp["loc"], fp["mask"], fp["w_in"], fp["b_in"],
      fp["w_res"], fp["b_res"], fp["w_out"], fp["b_out"])
    return h, ld


def mixcdf_conv_flow_forward(x4, fp, cfg):
    """x4: (B, C, 1, 1) -> (h:(B, C), logdet:(B,))."""
    B, C = x4.shape[0], x4.shape[1]
    x = x4.reshape(B, C).astype(jnp.float32)
    logdet = jnp.zeros((B,), jnp.float32)
    if cfg["preproc"]:
        logdet = logdet + jnp.sum(-_softplus(x) - _softplus(-x), axis=1)
        x = jax.nn.sigmoid(x)
    h_stored, ld = fused_flow_call(
        x, fp, depth=cfg["flow_hidden_depth"],
        n_comp=cfg["flow_cdf_components"], tb=cfg["batch_tile"])
    h = h_stored[:, fp["sigma_final"]]            # composed residual Shuffle
    logdet = logdet + ld[:, 0] + fp["actnorm_logdet"]
    return h, logdet


# ----------------------------------------------------------------------------
# Parameter init (torch-like layout) + offline shuffle folding
# ----------------------------------------------------------------------------
def init_params(key, C, hid, depth, K, n_flows):
    Ch = C // 2
    f32 = jnp.float32
    params = []
    for _ in range(n_flows):
        key, *ks = jax.random.split(key, 14)
        params.append(dict(
            loc=0.1 * jax.random.normal(ks[0], (C,), f32),
            logs=0.1 * jax.random.normal(ks[1], (C,), f32),
            w_in=jax.random.normal(ks[2], (Ch, hid), f32) / np.sqrt(Ch),
            b_in=0.05 * jax.random.normal(ks[3], (hid,), f32),
            w_res=jax.random.normal(ks[4], (depth, hid, hid), f32) / np.sqrt(hid),
            b_res=0.05 * jax.random.normal(ks[5], (depth, hid), f32),
            w_s=0.1 * jax.random.normal(ks[6], (hid, Ch), f32) / np.sqrt(hid),
            b_s=0.05 * jax.random.normal(ks[7], (Ch,), f32),
            w_t=0.1 * jax.random.normal(ks[8], (hid, Ch), f32) / np.sqrt(hid),
            b_t=0.05 * jax.random.normal(ks[9], (Ch,), f32),
            w_ml=0.1 * jax.random.normal(ks[10], (hid, 3, K, Ch), f32) / np.sqrt(hid),
            b_ml=0.05 * jax.random.normal(ks[11], (3, K, Ch), f32),
            perm=jax.random.permutation(ks[12], C),
        ))
    return params


def fold_params(params, C, hid, depth, K):
    """Fold every Shuffle into the NEXT flow's parameters so the kernel never
    permutes / splits / concatenates the channel axis of the activations."""
    Ch = C // 2
    P = 2 + 3 * K
    n = len(params)
    scale_t = np.zeros((n, 1, C), np.float32)
    loc_t = np.zeros((n, 1, C), np.float32)
    mask_t = np.zeros((n, 1, C), np.float32)
    w_in_t = np.zeros((n, C, hid), np.float32)
    b_in_t = np.zeros((n, 1, hid), np.float32)
    w_res_t = np.zeros((n, depth, hid, hid), np.float32)
    b_res_t = np.zeros((n, depth, 1, hid), np.float32)
    w_out_t = np.zeros((n, hid, P * C), np.float32)
    b_out_t = np.zeros((n, 1, P * C), np.float32)

    sigma = np.arange(C)              # true position j -> storage position
    actnorm_logdet = 0.0              # H = W = 1 so just sum(logs) per flow
    for i, p in enumerate(params):
        inv = np.argsort(sigma)
        logs = np.asarray(p["logs"], np.float32)
        scale_t[i, 0, :] = np.exp(logs)[inv]
        loc_t[i, 0, :] = np.asarray(p["loc"], np.float32)[inv]
        actnorm_logdet += float(logs.sum())

        keep_pos = sigma[:Ch]         # storage channels of the kept half
        trans_pos = sigma[Ch:]        # storage channels of the transformed half
        mask_t[i, 0, trans_pos] = 1.0

        w_in_t[i, keep_pos, :] = np.asarray(p["w_in"], np.float32)
        b_in_t[i, 0, :] = np.asarray(p["b_in"], np.float32)
        w_res_t[i] = np.asarray(p["w_res"], np.float32)
        b_res_t[i, :, 0, :] = np.asarray(p["b_res"], np.float32)

        w_out_t[i][:, 0 * C + trans_pos] = np.asarray(p["w_s"], np.float32)
        b_out_t[i, 0, 0 * C + trans_pos] = np.asarray(p["b_s"], np.float32)
        w_out_t[i][:, 1 * C + trans_pos] = np.asarray(p["w_t"], np.float32)
        b_out_t[i, 0, 1 * C + trans_pos] = np.asarray(p["b_t"], np.float32)
        w_ml = np.asarray(p["w_ml"], np.float32)     # (hid, 3, K, Ch)
        b_ml = np.asarray(p["b_ml"], np.float32)     # (3, K, Ch)
        for m in range(K):
            w_out_t[i][:, (2 + m) * C + trans_pos] = w_ml[:, 0, m, :]
            b_out_t[i, 0, (2 + m) * C + trans_pos] = b_ml[0, m, :]
            w_out_t[i][:, (2 + K + m) * C + trans_pos] = w_ml[:, 1, m, :]
            b_out_t[i, 0, (2 + K + m) * C + trans_pos] = b_ml[1, m, :]
            w_out_t[i][:, (2 + 2 * K + m) * C + trans_pos] = w_ml[:, 2, m, :]
            b_out_t[i, 0, (2 + 2 * K + m) * C + trans_pos] = b_ml[2, m, :]

        sigma = sigma[np.asarray(p["perm"])]         # compose this Shuffle

    return dict(
        scale=jnp.asarray(scale_t), loc=jnp.asarray(loc_t),
        mask=jnp.asarray(mask_t),
        w_in=jnp.asarray(w_in_t), b_in=jnp.asarray(b_in_t),
        w_res=jnp.asarray(w_res_t), b_res=jnp.asarray(b_res_t),
        w_out=jnp.asarray(w_out_t), b_out=jnp.asarray(b_out_t),
        sigma_final=jnp.asarray(sigma, jnp.int32),
        actnorm_logdet=jnp.float32(actnorm_logdet),
    )


# ----------------------------------------------------------------------------
# Pure-JAX reference (unfolded, mirrors the torch module structure)
# ----------------------------------------------------------------------------
def _lse(x, axis):
    m = jnp.max(x, axis=axis, keepdims=True)
    return m + jnp.log(jnp.sum(jnp.exp(x - m), axis=axis, keepdims=True))


def _template_ref(x1, p, depth):
    z = x1 @ p["w_in"] + p["b_in"]
    z = jnp.where(z >= 0, z, NET_LRELU_SLOPE * z)
    for d in range(depth):
        r = z @ p["w_res"][d] + p["b_res"][d]
        r = jnp.where(r >= 0, r, NET_LRELU_SLOPE * r)
        z = z + r
    s = jnp.tanh(z @ p["w_s"] + p["b_s"])
    t = z @ p["w_t"] + p["b_t"]
    ml = jnp.einsum("bh,hpkc->bpkc", z, p["w_ml"]) + p["b_ml"]
    return s, t, ml[:, 0], ml[:, 1], ml[:, 2]          # (B, K, Ch) each


def _mixlog_ref(x, logits, means, logscales):
    xk = x[:, None, :]
    lw = logits - _lse(logits, 1)
    z = (xk - means) * jnp.exp(-logscales)
    sp = _softplus(-z)
    log_cdf = _lse(lw - sp, 1)[:, 0, :]
    log_pdf = _lse(lw - z - logscales - 2.0 * sp, 1)[:, 0, :]
    return log_cdf, log_pdf


def reference_forward(x4, params, cfg):
    B, C = x4.shape[0], x4.shape[1]
    Ch = C // 2
    depth = cfg["flow_hidden_depth"]
    h = x4.reshape(B, C).astype(jnp.float32)
    logdet = jnp.zeros((B,), jnp.float32)
    if cfg["preproc"]:
        logdet = logdet + jnp.sum(-_softplus(h) - _softplus(-h), axis=1)
        h = jax.nn.sigmoid(h)
    for p in params:
        # ActNorm (assumed form; H = W = 1)
        h = jnp.exp(p["logs"]) * (h + p["loc"])
        logdet = logdet + jnp.sum(p["logs"])
        # InvLeakyRelu (0 logdet per source)
        h = jnp.where(h >= 0, h, INV_LRELU_ALPHA * h)
        # UnconditionalMixCDFCouplingBlock
        x1, x2 = h[:, :Ch], h[:, Ch:]
        s, t, lg, mu, lsc = _template_ref(x1, p, depth)
        log_cdf, log_pdf = _mixlog_ref(x2, lg, mu, lsc)
        y2 = jnp.exp(log_cdf)
        y2l = -jnp.log(1.0 / y2 - 1.0)                     # Inverse(FLowSigmoid)
        scale_ld = jnp.sum(-jnp.log(y2) - jnp.log(1.0 - y2), axis=1)
        y2o = y2l * jnp.exp(s) + t
        logdet = logdet + jnp.sum(log_pdf + s, axis=1) + scale_ld
        h = jnp.concatenate([x1, y2o], axis=1)
        # Shuffle
        h = h[:, p["perm"]]
    return h, logdet


# ----------------------------------------------------------------------------
if __name__ == "__main__":
    cfg = dict(
        latent_dim=(16, 1, 1),        # (C, H, W): flat latent, H = W = 1
        flow_mid_channels=32,
        flow_hidden_depth=2,
        flow_attn_heads=4,            # TODO(synk): attention heads not used
        flow_cdf_components=4,
        flow_p_drop=0.0,
        n_flows=4,
        reshape="none",
        shuffle=True,
        activation="lrelu",
        preproc=False,
        batch_tile=8,
    )
    B = 16
    C, Hs, Ws = cfg["latent_dim"]

    key = jax.random.PRNGKey(0)
    kx, kp = jax.random.split(key)
    x = jax.random.normal(kx, (B, C, Hs, Ws), jnp.float32)     # NCHW, H=W=1

    params = init_params(kp, C, cfg["flow_mid_channels"],
                         cfg["flow_hidden_depth"],
                         cfg["flow_cdf_components"], cfg["n_flows"])
    folded = fold_params(params, C, cfg["flow_mid_channels"],
                         cfg["flow_hidden_depth"], cfg["flow_cdf_components"])

    h_out, ld_out = mixcdf_conv_flow_forward(x, folded, cfg)
    h_out = jax.block_until_ready(h_out)
    ld_out = jax.block_until_ready(ld_out)

    h_ref, ld_ref = reference_forward(x, params, cfg)
    np.testing.assert_allclose(np.asarray(h_out), np.asarray(h_ref),
                               rtol=2e-3, atol=2e-3)
    np.testing.assert_allclose(np.asarray(ld_out), np.asarray(ld_ref),
                               rtol=2e-3, atol=2e-3)
    print("KERNEL_OK")
</pallas_src>

<mosaic_0001>
module attributes {stable_mosaic.version = 11 : i64} {
  func.func @fused_flow_kernel(%arg0: i32, %arg1: i32, %arg2: memref<8x16xf32, #tpu.memory_space<vmem>>, %arg3: memref<1x1x16xf32, #tpu.memory_space<vmem>>, %arg4: memref<1x1x16xf32, #tpu.memory_space<vmem>>, %arg5: memref<1x1x16xf32, #tpu.memory_space<vmem>>, %arg6: memref<1x16x32xf32, #tpu.memory_space<vmem>>, %arg7: memref<1x1x32xf32, #tpu.memory_space<vmem>>, %arg8: memref<1x2x32x32xf32, #tpu.memory_space<vmem>>, %arg9: memref<1x2x1x32xf32, #tpu.memory_space<vmem>>, %arg10: memref<1x32x224xf32, #tpu.memory_space<vmem>>, %arg11: memref<1x1x224xf32, #tpu.memory_space<vmem>>, %arg12: memref<8x16xf32, #tpu.memory_space<vmem>>, %arg13: memref<8x1xf32, #tpu.memory_space<vmem>>, %arg14: memref<8x16xf32, #tpu.memory_space<vmem>>, %arg15: memref<8x1xf32, #tpu.memory_space<vmem>>) attributes {dimension_semantics = [#tpu.dimension_semantics<parallel>, #tpu.dimension_semantics<arbitrary>], iteration_bounds = array<i64: 2, 4>, scalar_prefetch = 0 : i64, scratch_operands = 2 : i64, tpu.core_type = #tpu.core_type<tc>, window_params = [{transform_indices = @transform_0, window_bounds = array<i64: 8, 16>}, {transform_indices = @transform_1, window_bounds = array<i64: 1, 1, 16>}, {transform_indices = @transform_2, window_bounds = array<i64: 1, 1, 16>}, {transform_indices = @transform_3, window_bounds = array<i64: 1, 1, 16>}, {transform_indices = @transform_4, window_bounds = array<i64: 1, 16, 32>}, {transform_indices = @transform_5, window_bounds = array<i64: 1, 1, 32>}, {transform_indices = @transform_6, window_bounds = array<i64: 1, 2, 32, 32>}, {transform_indices = @transform_7, window_bounds = array<i64: 1, 2, 1, 32>}, {transform_indices = @transform_8, window_bounds = array<i64: 1, 32, 224>}, {transform_indices = @transform_9, window_bounds = array<i64: 1, 1, 224>}, {transform_indices = @transform_10, window_bounds = array<i64: 8, 16>}, {transform_indices = @transform_11, window_bounds = array<i64: 8, 1>}]} {
    %c0_i32 = arith.constant 0 : i32
    %0 = arith.cmpi eq, %arg1, %c0_i32 : i32
    %1 = arith.extui %0 : i1 to i32
    %c0_i32_0 = arith.constant 0 : i32
    %2 = arith.cmpi ne, %1, %c0_i32_0 : i32
    scf.if %2 {
      %c0_92 = arith.constant 0 : index
      %c0_93 = arith.constant 0 : index
      %266 = vector.load %arg2[%c0_92, %c0_93] : memref<8x16xf32, #tpu.memory_space<vmem>>, vector<8x16xf32>
      %c0_94 = arith.constant 0 : index
      %c0_95 = arith.constant 0 : index
      %267 = vector.load %arg14[%c0_94, %c0_95] : memref<8x16xf32, #tpu.memory_space<vmem>>, vector<8x16xf32>
      tpu.vector_store %arg14[%c0_94, %c0_95], %266 {strides = array<i32>} : memref<8x16xf32, #tpu.memory_space<vmem>>, vector<8x16xf32>,
      %cst_96 = arith.constant 0.000000e+00 : f32
      %268 = vector.broadcast %cst_96 : f32 to vector<8x1xf32>
      %c0_97 = arith.constant 0 : index
      %c0_98 = arith.constant 0 : index
      %269 = vector.load %arg15[%c0_97, %c0_98] : memref<8x1xf32, #tpu.memory_space<vmem>>, vector<8x1xf32>
      tpu.vector_store %arg15[%c0_97, %c0_98], %268 {strides = array<i32>} : memref<8x1xf32, #tpu.memory_space<vmem>>, vector<8x1xf32>,
    } else {
    }
    %c0 = arith.constant 0 : index
    %c0_1 = arith.constant 0 : index
    %3 = vector.load %arg14[%c0, %c0_1] : memref<8x16xf32, #tpu.memory_space<vmem>>, vector<8x16xf32>
    %c0_2 = arith.constant 0 : index
    %c0_3 = arith.constant 0 : index
    %c0_4 = arith.constant 0 : index
    %4 = vector.load %arg3[%c0_2, %c0_3, %c0_4] : memref<1x1x16xf32, #tpu.memory_space<vmem>>, vector<1x1x16xf32>
    %5 = vector.shape_cast %4 : vector<1x1x16xf32> to vector<1x16xf32>
    %c0_5 = arith.constant 0 : index
    %c0_6 = arith.constant 0 : index
    %c0_7 = arith.constant 0 : index
    %6 = vector.load %arg4[%c0_5, %c0_6, %c0_7] : memref<1x1x16xf32, #tpu.memory_space<vmem>>, vector<1x1x16xf32>
    %7 = vector.shape_cast %6 : vector<1x1x16xf32> to vector<1x16xf32>
    %8 = vector.broadcast %7 : vector<1x16xf32> to vector<8x16xf32>
    %9 = arith.addf %3, %8 : vector<8x16xf32>
    %10 = vector.broadcast %5 : vector<1x16xf32> to vector<8x16xf32>
    %11 = arith.mulf %10, %9 : vector<8x16xf32>
    %cst = arith.constant 0.000000e+00 : f32
    %12 = vector.broadcast %cst : f32 to vector<8x16xf32>
    %13 = arith.cmpf oge, %11, %12 : vector<8x16xf32>
    %cst_8 = arith.constant 0.899999976 : f32
    %14 = vector.broadcast %cst_8 : f32 to vector<8x16xf32>
    %15 = arith.mulf %14, %11 : vector<8x16xf32>
    %16 = arith.select %13, %11, %15 : vector<8x16xi1>, vector<8x16xf32>
    %c0_9 = arith.constant 0 : index
    %c0_10 = arith.constant 0 : index
    %c0_11 = arith.constant 0 : index
    %17 = vector.load %arg6[%c0_9, %c0_10, %c0_11] : memref<1x16x32xf32, #tpu.memory_space<vmem>>, vector<1x16x32xf32>
    %18 = vector.shape_cast %17 : vector<1x16x32xf32> to vector<16x32xf32>
    %cst_12 = arith.constant dense<0.000000e+00> : vector<8x32xf32>
    %19 = tpu.matmul %16, %18, %cst_12 {dimension_numbers = #tpu.dot_dimension_numbers<[1], [0], [0], [1], [0, 0, 1, 1], [], []>, precision = #tpu.contract_precision<fp32>} : vector<8x16xf32>, vector<16x32xf32>, vector<8x32xf32> -> vector<8x32xf32>
    %c0_13 = arith.constant 0 : index
    %c0_14 = arith.constant 0 : index
    %c0_15 = arith.constant 0 : index
    %20 = vector.load %arg7[%c0_13, %c0_14, %c0_15] : memref<1x1x32xf32, #tpu.memory_space<vmem>>, vector<1x1x32xf32>
    %21 = vector.shape_cast %20 : vector<1x1x32xf32> to vector<1x32xf32>
    %22 = vector.broadcast %21 : vector<1x32xf32> to vector<8x32xf32>
    %23 = arith.addf %19, %22 : vector<8x32xf32>
    %cst_16 = arith.constant 0.000000e+00 : f32
    %24 = vector.broadcast %cst_16 : f32 to vector<8x32xf32>
    %25 = arith.cmpf oge, %23, %24 : vector<8x32xf32>
    %cst_17 = arith.constant 0.00999999977 : f32
    %26 = vector.broadcast %cst_17 : f32 to vector<8x32xf32>
    %27 = arith.mulf %26, %23 : vector<8x32xf32>
    %28 = arith.select %25, %23, %27 : vector<8x32xi1>, vector<8x32xf32>
    %c0_18 = arith.constant 0 : index
    %c0_19 = arith.constant 0 : index
    %c0_20 = arith.constant 0 : index
    %c0_21 = arith.constant 0 : index
    %29 = vector.load %arg8[%c0_18, %c0_19, %c0_20, %c0_21] : memref<1x2x32x32xf32, #tpu.memory_space<vmem>>, vector<1x1x32x32xf32>
    %30 = vector.shape_cast %29 : vector<1x1x32x32xf32> to vector<32x32xf32>
    %cst_22 = arith.constant dense<0.000000e+00> : vector<8x32xf32>
    %31 = tpu.matmul %28, %30, %cst_22 {dimension_numbers = #tpu.dot_dimension_numbers<[1], [0], [0], [1], [0, 0, 1, 1], [], []>, precision = #tpu.contract_precision<fp32>} : vector<8x32xf32>, vector<32x32xf32>, vector<8x32xf32> -> vector<8x32xf32>
    %c0_23 = arith.constant 0 : index
    %c0_24 = arith.constant 0 : index
    %c0_25 = arith.constant 0 : index
    %c0_26 = arith.constant 0 : index
    %32 = vector.load %arg9[%c0_23, %c0_24, %c0_25, %c0_26] : memref<1x2x1x32xf32, #tpu.memory_space<vmem>>, vector<1x1x1x32xf32>
    %33 = vector.shape_cast %32 : vector<1x1x1x32xf32> to vector<1x32xf32>
    %34 = vector.broadcast %33 : vector<1x32xf32> to vector<8x32xf32>
    %35 = arith.addf %31, %34 : vector<8x32xf32>
    %cst_27 = arith.constant 0.000000e+00 : f32
    %36 = vector.broadcast %cst_27 : f32 to vector<8x32xf32>
    %37 = arith.cmpf oge, %35, %36 : vector<8x32xf32>
    %cst_28 = arith.constant 0.00999999977 : f32
    %38 = vector.broadcast %cst_28 : f32 to vector<8x32xf32>
    %39 = arith.mulf %38, %35 : vector<8x32xf32>
    %40 = arith.select %37, %35, %39 : vector<8x32xi1>, vector<8x32xf32>
    %41 = arith.addf %28, %40 : vector<8x32xf32>
    %c0_29 = arith.constant 0 : index
    %c1 = arith.constant 1 : index
    %c0_30 = arith.constant 0 : index
    %c0_31 = arith.constant 0 : index
    %42 = vector.load %arg8[%c0_29, %c1, %c0_30, %c0_31] : memref<1x2x32x32xf32, #tpu.memory_space<vmem>>, vector<1x1x32x32xf32>
    %43 = vector.shape_cast %42 : vector<1x1x32x32xf32> to vector<32x32xf32>
    %cst_32 = arith.constant dense<0.000000e+00> : vector<8x32xf32>
    %44 = tpu.matmul %41, %43, %cst_32 {dimension_numbers = #tpu.dot_dimension_numbers<[1], [0], [0], [1], [0, 0, 1, 1], [], []>, precision = #tpu.contract_precision<fp32>} : vector<8x32xf32>, vector<32x32xf32>, vector<8x32xf32> -> vector<8x32xf32>
    %c0_33 = arith.constant 0 : index
    %c1_34 = arith.constant 1 : index
    %c0_35 = arith.constant 0 : index
    %c0_36 = arith.constant 0 : index
    %45 = vector.load %arg9[%c0_33, %c1_34, %c0_35, %c0_36] : memref<1x2x1x32xf32, #tpu.memory_space<vmem>>, vector<1x1x1x32xf32>
    %46 = vector.shape_cast %45 : vector<1x1x1x32xf32> to vector<1x32xf32>
    %47 = vector.broadcast %46 : vector<1x32xf32> to vector<8x32xf32>
    %48 = arith.addf %44, %47 : vector<8x32xf32>
    %cst_37 = arith.constant 0.000000e+00 : f32
    %49 = vector.broadcast %cst_37 : f32 to vector<8x32xf32>
    %50 = arith.cmpf oge, %48, %49 : vector<8x32xf32>
    %cst_38 = arith.constant 0.00999999977 : f32
    %51 = vector.broadcast %cst_38 : f32 to vector<8x32xf32>
    %52 = arith.mulf %51, %48 : vector<8x32xf32>
    %53 = arith.select %50, %48, %52 : vector<8x32xi1>, vector<8x32xf32>
    %54 = arith.addf %41, %53 : vector<8x32xf32>
    %c0_39 = arith.constant 0 : index
    %c0_40 = arith.constant 0 : index
    %c0_41 = arith.constant 0 : index
    %55 = vector.load %arg10[%c0_39, %c0_40, %c0_41] : memref<1x32x224xf32, #tpu.memory_space<vmem>>, vector<1x32x224xf32>
    %56 = vector.shape_cast %55 : vector<1x32x224xf32> to vector<32x224xf32>
    %cst_42 = arith.constant dense<0.000000e+00> : vector<8x224xf32>
    %57 = tpu.matmul %54, %56, %cst_42 {dimension_numbers = #tpu.dot_dimension_numbers<[1], [0], [0], [1], [0, 0, 1, 1], [], []>, precision = #tpu.contract_precision<fp32>} : vector<8x32xf32>, vector<32x224xf32>, vector<8x224xf32> -> vector<8x224xf32>
    %c0_43 = arith.constant 0 : index
    %c0_44 = arith.constant 0 : index
    %c0_45 = arith.constant 0 : index
    %58 = vector.load %arg11[%c0_43, %c0_44, %c0_45] : memref<1x1x224xf32, #tpu.memory_space<vmem>>, vector<1x1x224xf32>
    %59 = vector.shape_cast %58 : vector<1x1x224xf32> to vector<1x224xf32>
    %60 = vector.broadcast %59 : vector<1x224xf32> to vector<8x224xf32>
    %61 = arith.addf %57, %60 : vector<8x224xf32>
    %62 = vector.extract_strided_slice %61 {offsets = [0, 0], sizes = [8, 16], strides = [1, 1]} : vector<8x224xf32> to vector<8x16xf32>
    %63 = math.tanh %62 : vector<8x16xf32>
    %64 = vector.extract_strided_slice %61 {offsets = [0, 16], sizes = [8, 16], strides = [1, 1]} : vector<8x224xf32> to vector<8x16xf32>
    %65 = vector.extract_strided_slice %61 {offsets = [0, 32], sizes = [8, 16], strides = [1, 1]} : vector<8x224xf32> to vector<8x16xf32>
    %66 = vector.extract_strided_slice %61 {offsets = [0, 48], sizes = [8, 16], strides = [1, 1]} : vector<8x224xf32> to vector<8x16xf32>
    %67 = vector.extract_strided_slice %61 {offsets = [0, 64], sizes = [8, 16], strides = [1, 1]} : vector<8x224xf32> to vector<8x16xf32>
    %68 = vector.extract_strided_slice %61 {offsets = [0, 80], sizes = [8, 16], strides = [1, 1]} : vector<8x224xf32> to vector<8x16xf32>
    %69 = vector.extract_strided_slice %61 {offsets = [0, 96], sizes = [8, 16], strides = [1, 1]} : vector<8x224xf32> to vector<8x16xf32>
    %70 = vector.extract_strided_slice %61 {offsets = [0, 112], sizes = [8, 16], strides = [1, 1]} : vector<8x224xf32> to vector<8x16xf32>
    %71 = vector.extract_strided_slice %61 {offsets = [0, 128], sizes = [8, 16], strides = [1, 1]} : vector<8x224xf32> to vector<8x16xf32>
    %72 = vector.extract_strided_slice %61 {offsets = [0, 144], sizes = [8, 16], strides = [1, 1]} : vector<8x224xf32> to vector<8x16xf32>
    %73 = vector.extract_strided_slice %61 {offsets = [0, 160], sizes = [8, 16], strides = [1, 1]} : vector<8x224xf32> to vector<8x16xf32>
    %74 = vector.extract_strided_slice %61 {offsets = [0, 176], sizes = [8, 16], strides = [1, 1]} : vector<8x224xf32> to vector<8x16xf32>
    %75 = vector.extract_strided_slice %61 {offsets = [0, 192], sizes = [8, 16], strides = [1, 1]} : vector<8x224xf32> to vector<8x16xf32>
    %76 = vector.extract_strided_slice %61 {offsets = [0, 208], sizes = [8, 16], strides = [1, 1]} : vector<8x224xf32> to vector<8x16xf32>
    %77 = arith.maximumf %65, %66 : vector<8x16xf32>
    %78 = arith.maximumf %77, %67 : vector<8x16xf32>
    %79 = arith.maximumf %78, %68 : vector<8x16xf32>
    %cst_46 = arith.constant 0.000000e+00 : f32
    %80 = vector.broadcast %cst_46 : f32 to vector<8x16xf32>
    %81 = arith.subf %65, %79 : vector<8x16xf32>
    %82 = math.exp %81 : vector<8x16xf32>
    %83 = arith.addf %80, %82 : vector<8x16xf32>
    %84 = arith.subf %66, %79 : vector<8x16xf32>
    %85 = math.exp %84 : vector<8x16xf32>
    %86 = arith.addf %83, %85 : vector<8x16xf32>
    %87 = arith.subf %67, %79 : vector<8x16xf32>
    %88 = math.exp %87 : vector<8x16xf32>
    %89 = arith.addf %86, %88 : vector<8x16xf32>
    %90 = arith.subf %68, %79 : vector<8x16xf32>
    %91 = math.exp %90 : vector<8x16xf32>
    %92 = arith.addf %89, %91 : vector<8x16xf32>
    %93 = math.log %92 : vector<8x16xf32>
    %94 = arith.addf %79, %93 : vector<8x16xf32>
    %95 = arith.subf %65, %94 : vector<8x16xf32>
    %96 = arith.subf %16, %69 : vector<8x16xf32>
    %cst_47 = arith.constant 0.000000e+00 : f32
    %97 = vector.broadcast %cst_47 : f32 to vector<8x16xf32>
    %98 = arith.subf %97, %73 : vector<8x16xf32>
    %99 = math.exp %98 : vector<8x16xf32>
    %100 = arith.mulf %96, %99 : vector<8x16xf32>
    %cst_48 = arith.constant 0.000000e+00 : f32
    %101 = vector.broadcast %cst_48 : f32 to vector<8x16xf32>
    %102 = arith.subf %101, %100 : vector<8x16xf32>
    %cst_49 = arith.constant 0.000000e+00 : f32
    %103 = vector.broadcast %cst_49 : f32 to vector<8x16xf32>
    %104 = arith.maximumf %102, %103 : vector<8x16xf32>
    %105 = math.absf %102 : vector<8x16xf32>
    %cst_50 = arith.constant 0.000000e+00 : f32
    %106 = vector.broadcast %cst_50 : f32 to vector<8x16xf32>
    %107 = arith.subf %106, %105 : vector<8x16xf32>
    %108 = math.exp %107 : vector<8x16xf32>
    %cst_51 = arith.constant 1.000000e+00 : f32
    %109 = vector.broadcast %cst_51 : f32 to vector<8x16xf32>
    %110 = arith.addf %109, %108 : vector<8x16xf32>
    %111 = math.log %110 : vector<8x16xf32>
    %112 = arith.addf %104, %111 : vector<8x16xf32>
    %113 = arith.subf %95, %112 : vector<8x16xf32>
    %114 = arith.subf %95, %100 : vector<8x16xf32>
    %115 = arith.subf %114, %73 : vector<8x16xf32>
    %cst_52 = arith.constant 2.000000e+00 : f32
    %116 = vector.broadcast %cst_52 : f32 to vector<8x16xf32>
    %117 = arith.mulf %116, %112 : vector<8x16xf32>
    %118 = arith.subf %115, %117 : vector<8x16xf32>
    %119 = arith.subf %66, %94 : vector<8x16xf32>
    %120 = arith.subf %16, %70 : vector<8x16xf32>
    %cst_53 = arith.constant 0.000000e+00 : f32
    %121 = vector.broadcast %cst_53 : f32 to vector<8x16xf32>
    %122 = arith.subf %121, %74 : vector<8x16xf32>
    %123 = math.exp %122 : vector<8x16xf32>
    %124 = arith.mulf %120, %123 : vector<8x16xf32>
    %cst_54 = arith.constant 0.000000e+00 : f32
    %125 = vector.broadcast %cst_54 : f32 to vector<8x16xf32>
    %126 = arith.subf %125, %124 : vector<8x16xf32>
    %cst_55 = arith.constant 0.000000e+00 : f32
    %127 = vector.broadcast %cst_55 : f32 to vector<8x16xf32>
    %128 = arith.maximumf %126, %127 : vector<8x16xf32>
    %129 = math.absf %126 : vector<8x16xf32>
    %cst_56 = arith.constant 0.000000e+00 : f32
    %130 = vector.broadcast %cst_56 : f32 to vector<8x16xf32>
    %131 = arith.subf %130, %129 : vector<8x16xf32>
    %132 = math.exp %131 : vector<8x16xf32>
    %cst_57 = arith.constant 1.000000e+00 : f32
    %133 = vector.broadcast %cst_57 : f32 to vector<8x16xf32>
    %134 = arith.addf %133, %132 : vector<8x16xf32>
    %135 = math.log %134 : vector<8x16xf32>
    %136 = arith.addf %128, %135 : vector<8x16xf32>
    %137 = arith.subf %119, %136 : vector<8x16xf32>
    %138 = arith.subf %119, %124 : vector<8x16xf32>
    %139 = arith.subf %138, %74 : vector<8x16xf32>
    %cst_58 = arith.constant 2.000000e+00 : f32
    %140 = vector.broadcast %cst_58 : f32 to vector<8x16xf32>
    %141 = arith.mulf %140, %136 : vector<8x16xf32>
    %142 = arith.subf %139, %141 : vector<8x16xf32>
    %143 = arith.subf %67, %94 : vector<8x16xf32>
    %144 = arith.subf %16, %71 : vector<8x16xf32>
    %cst_59 = arith.constant 0.000000e+00 : f32
    %145 = vector.broadcast %cst_59 : f32 to vector<8x16xf32>
    %146 = arith.subf %145, %75 : vector<8x16xf32>
    %147 = math.exp %146 : vector<8x16xf32>
    %148 = arith.mulf %144, %147 : vector<8x16xf32>
    %cst_60 = arith.constant 0.000000e+00 : f32
    %149 = vector.broadcast %cst_60 : f32 to vector<8x16xf32>
    %150 = arith.subf %149, %148 : vector<8x16xf32>
    %cst_61 = arith.constant 0.000000e+00 : f32
    %151 = vector.broadcast %cst_61 : f32 to vector<8x16xf32>
    %152 = arith.maximumf %150, %151 : vector<8x16xf32>
    %153 = math.absf %150 : vector<8x16xf32>
    %cst_62 = arith.constant 0.000000e+00 : f32
    %154 = vector.broadcast %cst_62 : f32 to vector<8x16xf32>
    %155 = arith.subf %154, %153 : vector<8x16xf32>
    %156 = math.exp %155 : vector<8x16xf32>
    %cst_63 = arith.constant 1.000000e+00 : f32
    %157 = vector.broadcast %cst_63 : f32 to vector<8x16xf32>
    %158 = arith.addf %157, %156 : vector<8x16xf32>
    %159 = math.log %158 : vector<8x16xf32>
    %160 = arith.addf %152, %159 : vector<8x16xf32>
    %161 = arith.subf %143, %160 : vector<8x16xf32>
    %162 = arith.subf %143, %148 : vector<8x16xf32>
    %163 = arith.subf %162, %75 : vector<8x16xf32>
    %cst_64 = arith.constant 2.000000e+00 : f32
    %164 = vector.broadcast %cst_64 : f32 to vector<8x16xf32>
    %165 = arith.mulf %164, %160 : vector<8x16xf32>
    %166 = arith.subf %163, %165 : vector<8x16xf32>
    %167 = arith.subf %68, %94 : vector<8x16xf32>
    %168 = arith.subf %16, %72 : vector<8x16xf32>
    %cst_65 = arith.constant 0.000000e+00 : f32
    %169 = vector.broadcast %cst_65 : f32 to vector<8x16xf32>
    %170 = arith.subf %169, %76 : vector<8x16xf32>
    %171 = math.exp %170 : vector<8x16xf32>
    %172 = arith.mulf %168, %171 : vector<8x16xf32>
    %cst_66 = arith.constant 0.000000e+00 : f32
    %173 = vector.broadcast %cst_66 : f32 to vector<8x16xf32>
    %174 = arith.subf %173, %172 : vector<8x16xf32>
    %cst_67 = arith.constant 0.000000e+00 : f32
    %175 = vector.broadcast %cst_67 : f32 to vector<8x16xf32>
    %176 = arith.maximumf %174, %175 : vector<8x16xf32>
    %177 = math.absf %174 : vector<8x16xf32>
    %cst_68 = arith.constant 0.000000e+00 : f32
    %178 = vector.broadcast %cst_68 : f32 to vector<8x16xf32>
    %179 = arith.subf %178, %177 : vector<8x16xf32>
    %180 = math.exp %179 : vector<8x16xf32>
    %cst_69 = arith.constant 1.000000e+00 : f32
    %181 = vector.broadcast %cst_69 : f32 to vector<8x16xf32>
    %182 = arith.addf %181, %180 : vector<8x16xf32>
    %183 = math.log %182 : vector<8x16xf32>
    %184 = arith.addf %176, %183 : vector<8x16xf32>
    %185 = arith.subf %167, %184 : vector<8x16xf32>
    %186 = arith.subf %167, %172 : vector<8x16xf32>
    %187 = arith.subf %186, %76 : vector<8x16xf32>
    %cst_70 = arith.constant 2.000000e+00 : f32
    %188 = vector.broadcast %cst_70 : f32 to vector<8x16xf32>
    %189 = arith.mulf %188, %184 : vector<8x16xf32>
    %190 = arith.subf %187, %189 : vector<8x16xf32>
    %191 = arith.maximumf %113, %137 : vector<8x16xf32>
    %192 = arith.maximumf %191, %161 : vector<8x16xf32>
    %193 = arith.maximumf %192, %185 : vector<8x16xf32>
    %cst_71 = arith.constant 0.000000e+00 : f32
    %194 = vector.broadcast %cst_71 : f32 to vector<8x16xf32>
    %195 = arith.subf %113, %193 : vector<8x16xf32>
    %196 = math.exp %195 : vector<8x16xf32>
    %197 = arith.addf %194, %196 : vector<8x16xf32>
    %198 = arith.subf %137, %193 : vector<8x16xf32>
    %199 = math.exp %198 : vector<8x16xf32>
    %200 = arith.addf %197, %199 : vector<8x16xf32>
    %201 = arith.subf %161, %193 : vector<8x16xf32>
    %202 = math.exp %201 : vector<8x16xf32>
    %203 = arith.addf %200, %202 : vector<8x16xf32>
    %204 = arith.subf %185, %193 : vector<8x16xf32>
    %205 = math.exp %204 : vector<8x16xf32>
    %206 = arith.addf %203, %205 : vector<8x16xf32>
    %207 = math.log %206 : vector<8x16xf32>
    %208 = arith.addf %193, %207 : vector<8x16xf32>
    %209 = arith.maximumf %118, %142 : vector<8x16xf32>
    %210 = arith.maximumf %209, %166 : vector<8x16xf32>
    %211 = arith.maximumf %210, %190 : vector<8x16xf32>
    %cst_72 = arith.constant 0.000000e+00 : f32
    %212 = vector.broadcast %cst_72 : f32 to vector<8x16xf32>
    %213 = arith.subf %118, %211 : vector<8x16xf32>
    %214 = math.exp %213 : vector<8x16xf32>
    %215 = arith.addf %212, %214 : vector<8x16xf32>
    %216 = arith.subf %142, %211 : vector<8x16xf32>
    %217 = math.exp %216 : vector<8x16xf32>
    %218 = arith.addf %215, %217 : vector<8x16xf32>
    %219 = arith.subf %166, %211 : vector<8x16xf32>
    %220 = math.exp %219 : vector<8x16xf32>
    %221 = arith.addf %218, %220 : vector<8x16xf32>
    %222 = arith.subf %190, %211 : vector<8x16xf32>
    %223 = math.exp %222 : vector<8x16xf32>
    %224 = arith.addf %221, %223 : vector<8x16xf32>
    %225 = math.log %224 : vector<8x16xf32>
    %226 = arith.addf %211, %225 : vector<8x16xf32>
    %227 = math.exp %208 : vector<8x16xf32>
    %cst_73 = arith.constant 1.000000e+00 : f32
    %228 = vector.broadcast %cst_73 : f32 to vector<8x16xf32>
    %229 = arith.divf %228, %227 : vector<8x16xf32>
    %cst_74 = arith.constant 1.000000e+00 : f32
    %230 = vector.broadcast %cst_74 : f32 to vector<8x16xf32>
    %231 = arith.subf %229, %230 : vector<8x16xf32>
    %232 = math.log %231 : vector<8x16xf32>
    %cst_75 = arith.constant 0.000000e+00 : f32
    %233 = vector.broadcast %cst_75 : f32 to vector<8x16xf32>
    %234 = arith.subf %233, %232 : vector<8x16xf32>
    %235 = math.log %227 : vector<8x16xf32>
    %cst_76 = arith.constant 0.000000e+00 : f32
    %236 = vector.broadcast %cst_76 : f32 to vector<8x16xf32>
    %237 = arith.subf %236, %235 : vector<8x16xf32>
    %cst_77 = arith.constant 1.000000e+00 : f32
    %238 = vector.broadcast %cst_77 : f32 to vector<8x16xf32>
    %239 = arith.subf %238, %227 : vector<8x16xf32>
    %240 = math.log %239 : vector<8x16xf32>
    %241 = arith.subf %237, %240 : vector<8x16xf32>
    %242 = math.exp %63 : vector<8x16xf32>
    %243 = arith.mulf %234, %242 : vector<8x16xf32>
    %244 = arith.addf %243, %64 : vector<8x16xf32>
    %245 = arith.addf %226, %63 : vector<8x16xf32>
    %246 = arith.addf %245, %241 : vector<8x16xf32>
    %c0_78 = arith.constant 0 : index
    %c0_79 = arith.constant 0 : index
    %c0_80 = arith.constant 0 : index
    %247 = vector.load %arg5[%c0_78, %c0_79, %c0_80] : memref<1x1x16xf32, #tpu.memory_space<vmem>>, vector<1x1x16xf32>
    %248 = vector.shape_cast %247 : vector<1x1x16xf32> to vector<1x16xf32>
    %cst_81 = arith.constant 0.000000e+00 : f32
    %249 = vector.broadcast %cst_81 : f32 to vector<8x16xf32>
    %250 = vector.broadcast %248 : vector<1x16xf32> to vector<8x16xf32>
    %251 = arith.addf %250, %249 : vector<8x16xf32>
    %cst_82 = arith.constant 5.000000e-01 : f32
    %252 = vector.broadcast %cst_82 : f32 to vector<8x16xf32>
    %253 = arith.cmpf ogt, %251, %252 : vector<8x16xf32>
    %254 = arith.select %253, %244, %16 : vector<8x16xi1>, vector<8x16xf32>
    %c0_83 = arith.constant 0 : index
    %c0_84 = arith.constant 0 : index
    %255 = vector.load %arg15[%c0_83, %c0_84] : memref<8x1xf32, #tpu.memory_space<vmem>>, vector<8x1xf32>
    %cst_85 = arith.constant 0.000000e+00 : f32
    %256 = vector.broadcast %cst_85 : f32 to vector<8x16xf32>
    %257 = arith.select %253, %246, %256 : vector<8x16xi1>, vector<8x16xf32>
    %cst_86 = arith.constant dense<0.000000e+00> : vector<8xf32>
    %258 = vector.multi_reduction <add>, %257, %cst_86 [1] : vector<8x16xf32> to vector<8xf32>
    %259 = vector.shape_cast %258 : vector<8xf32> to vector<8x1xf32>
    %260 = arith.addf %255, %259 : vector<8x1xf32>
    %c0_87 = arith.constant 0 : index
    %c0_88 = arith.constant 0 : index
    %261 = vector.load %arg14[%c0_87, %c0_88] : memref<8x16xf32, #tpu.memory_space<vmem>>, vector<8x16xf32>
    tpu.vector_store %arg14[%c0_87, %c0_88], %254 {strides = array<i32>} : memref<8x16xf32, #tpu.memory_space<vmem>>, vector<8x16xf32>,
    %c0_89 = arith.constant 0 : index
    %c0_90 = arith.constant 0 : index
    %262 = vector.load %arg15[%c0_89, %c0_90] : memref<8x1xf32, #tpu.memory_space<vmem>>, vector<8x1xf32>
    tpu.vector_store %arg15[%c0_89, %c0_90], %260 {strides = array<i32>} : memref<8x1xf32, #tpu.memory_space<vmem>>, vector<8x1xf32>,
    %c3_i32 = arith.constant 3 : i32
    %263 = arith.cmpi eq, %arg1, %c3_i32 : i32
    %264 = arith.extui %263 : i1 to i32
    %c0_i32_91 = arith.constant 0 : i32
    %265 = arith.cmpi ne, %264, %c0_i32_91 : i32
    scf.if %265 {
      %c0_92 = arith.constant 0 : index
      %c0_93 = arith.constant 0 : index
      %266 = vector.load %arg12[%c0_92, %c0_93] : memref<8x16xf32, #tpu.memory_space<vmem>>, vector<8x16xf32>
      tpu.vector_store %arg12[%c0_92, %c0_93], %254 {strides = array<i32>} : memref<8x16xf32, #tpu.memory_space<vmem>>, vector<8x16xf32>,
      %c0_94 = arith.constant 0 : index
      %c0_95 = arith.constant 0 : index
      %267 = vector.load %arg13[%c0_94, %c0_95] : memref<8x1xf32, #tpu.memory_space<vmem>>, vector<8x1xf32>
      tpu.vector_store %arg13[%c0_94, %c0_95], %260 {strides = array<i32>} : memref<8x1xf32, #tpu.memory_space<vmem>>, vector<8x1xf32>,
    } else {
    }
    return
  }
  func.func @transform_0(%arg0: i32, %arg1: i32) -> (i32, i32) {
    %c0_i32 = arith.constant 0 : i32
    %c0_i32_0 = arith.constant 0 : i32
    return %arg0, %c0_i32 : i32, i32
  }
  func.func @transform_1(%arg0: i32, %arg1: i32) -> (i32, i32, i32) {
    %c0_i32 = arith.constant 0 : i32
    %c0_i32_0 = arith.constant 0 : i32
    %c0_i32_1 = arith.constant 0 : i32
    return %arg1, %c0_i32, %c0_i32_0 : i32, i32, i32
  }
  func.func @transform_2(%arg0: i32, %arg1: i32) -> (i32, i32, i32) {
    %c0_i32 = arith.constant 0 : i32
    %c0_i32_0 = arith.constant 0 : i32
    %c0_i32_1 = arith.constant 0 : i32
    return %arg1, %c0_i32, %c0_i32_0 : i32, i32, i32
  }
  func.func @transform_3(%arg0: i32, %arg1: i32) -> (i32, i32, i32) {
    %c0_i32 = arith.constant 0 : i32
    %c0_i32_0 = arith.constant 0 : i32
    %c0_i32_1 = arith.constant 0 : i32
    return %arg1, %c0_i32, %c0_i32_0 : i32, i32, i32
  }
  func.func @transform_4(%arg0: i32, %arg1: i32) -> (i32, i32, i32) {
    %c0_i32 = arith.constant 0 : i32
    %c0_i32_0 = arith.constant 0 : i32
    %c0_i32_1 = arith.constant 0 : i32
    return %arg1, %c0_i32, %c0_i32_0 : i32, i32, i32
  }
  func.func @transform_5(%arg0: i32, %arg1: i32) -> (i32, i32, i32) {
    %c0_i32 = arith.constant 0 : i32
    %c0_i32_0 = arith.constant 0 : i32
    %c0_i32_1 = arith.constant 0 : i32
    return %arg1, %c0_i32, %c0_i32_0 : i32, i32, i32
  }
  func.func @transform_6(%arg0: i32, %arg1: i32) -> (i32, i32, i32, i32) {
    %c0_i32 = arith.constant 0 : i32
    %c0_i32_0 = arith.constant 0 : i32
    %c0_i32_1 = arith.constant 0 : i32
    %c0_i32_2 = arith.constant 0 : i32
    return %arg1, %c0_i32, %c0_i32_0, %c0_i32_1 : i32, i32, i32, i32
  }
  func.func @transform_7(%arg0: i32, %arg1: i32) -> (i32, i32, i32, i32) {
    %c0_i32 = arith.constant 0 : i32
    %c0_i32_0 = arith.constant 0 : i32
    %c0_i32_1 = arith.constant 0 : i32
    %c0_i32_2 = arith.constant 0 : i32
    return %arg1, %c0_i32, %c0_i32_0, %c0_i32_1 : i32, i32, i32, i32
  }
  func.func @transform_8(%arg0: i32, %arg1: i32) -> (i32, i32, i32) {
    %c0_i32 = arith.constant 0 : i32
    %c0_i32_0 = arith.constant 0 : i32
    %c0_i32_1 = arith.constant 0 : i32
    return %arg1, %c0_i32, %c0_i32_0 : i32, i32, i32
  }
  func.func @transform_9(%arg0: i32, %arg1: i32) -> (i32, i32, i32) {
    %c0_i32 = arith.constant 0 : i32
    %c0_i32_0 = arith.constant 0 : i32
    %c0_i32_1 = arith.constant 0 : i32
    return %arg1, %c0_i32, %c0_i32_0 : i32, i32, i32
  }
  func.func @transform_10(%arg0: i32, %arg1: i32) -> (i32, i32) {
    %c0_i32 = arith.constant 0 : i32
    %c0_i32_0 = arith.constant 0 : i32
    return %arg0, %c0_i32 : i32, i32
  }
  func.func @transform_11(%arg0: i32, %arg1: i32) -> (i32, i32) {
    %c0_i32 = arith.constant 0 : i32
    %c0_i32_0 = arith.constant 0 : i32
    return %arg0, %c0_i32 : i32, i32
  }
}

</mosaic_0001>

<bundles_post_ra>
// kernel: tpu_custom_call.1
= control target key start
LH: loop header
LB: loop body
LE: loop exit
PB: predicated region body
PF: predicated region fallthrough
CT: control target
= control target key end

     0   :  { %s3742_s0 = inlined_call_operand.hbm [shape: f32[16,16], index: 0, kind: input, shape index: {}]   ;;  %s3743_s1 = inlined_call_operand.hbm [shape: f32[4,1,16], index: 1, kind: input, shape index: {}]   ;;  %s3744_s2 = inlined_call_operand.hbm [shape: f32[4,1,16], index: 2, kind: input, shape index: {}]   ;;  %s3745_s3 = inlined_call_operand.hbm [shape: f32[4,1,16], index: 3, kind: input, shape index: {}]   ;;  %s3746_s4 = inlined_call_operand.hbm [shape: f32[4,16,32], index: 4, kind: input, shape index: {}]   ;;  %s3747_s5 = inlined_call_operand.hbm [shape: f32[4,1,32], index: 5, kind: input, shape index: {}]   ;;  %s3748_s6 = inlined_call_operand.hbm [shape: f32[4,2,32,32], index: 6, kind: input, shape index: {}]   ;;  %s3749_s7 = inlined_call_operand.hbm [shape: f32[4,2,1,32], index: 7, kind: input, shape index: {}]   ;;  %s3750_s8 = inlined_call_operand.hbm [shape: f32[4,32,224], index: 8, kind: input, shape index: {}]   ;;  %s3751_s9 = inlined_call_operand.vmem [shape: f32[4,1,224], index: 9, kind: input, shape index: {}]   ;;  %s3752_s10 = inlined_call_operand.hbm [shape: f32[16,16], index: 10, kind: output, shape index: {0}]   ;;  %s3753_s11 = inlined_call_operand.vmem [shape: f32[16,1], index: 11, kind: output, shape index: {1}]  }
   0x1   :  { %3770 = sst [smem:[#allocation37_spill]] %s3742_s0 }
   0x2   :  { %3771 = sst [smem:[#allocation38_spill]] %s3743_s1 }
   0x3   :  { %3772 = sst [smem:[#allocation39_spill]] %s3744_s2 }
   0x4   :  { %3773 = sst [smem:[#allocation40_spill]] %s3745_s3 }
   0x5   :  { %3774 = sst [smem:[#allocation41_spill]] %s3746_s4 }
   0x6   :  { %3775 = sst [smem:[#allocation42_spill]] %s3747_s5 }
   0x7   :  { %3776 = sst [smem:[#allocation43_spill]] %s3749_s7 }
   0x8   :  { %3777 = sst [smem:[#allocation44_spill]] %s3751_s9 }
   0x9   :  { %3778 = sst [smem:[#allocation45_spill]] %s3752_s10 }
   0xa   :  { %3779 = sst [smem:[#allocation46_spill]] %s3753_s11 }
   0xb   :  { %17 = vsyncpa [#allocation5], 0 }
   0xc   :  { %19 = vsyncpa [#allocation5 + $0x1], 0 }
   0xd   :  { %20 = vsyncpa [#allocation8], 0 }
   0xe   :  { %22 = vsyncpa [#allocation8 + $0x1], 0 }
   0xf   :  { %23 = vsyncpa [#allocation11], 0 }
  0x10   :  { %25 = vsyncpa [#allocation11 + $0x1], 0 }
  0x11   :  { %26 = vsyncpa [#allocation14], 0 }
  0x12   :  { %28 = vsyncpa [#allocation14 + $0x1], 0 }
  0x13   :  { %29 = vsyncpa [#allocation17], 0 }
  0x14   :  { %31 = vsyncpa [#allocation17 + $0x1], 0 }
  0x15   :  { %32 = vsyncpa [#allocation6], 0 }
  0x16   :  { %34 = vsyncpa [#allocation6 + $0x1], 0  ;;  %s3162_s17 = smov 0   ;;  %s3164_s18 = smov 0  }
  0x17   :  { %s3166_s19 = smov 0   ;;  %s3168_s20 = smov 0  }
  0x18   :  { %s3170_s21 = smov 0   ;;  %s3172_s22 = smov 0  }
  0x19   :  { %s3174_s23 = smov 0   ;;  %s3176_s24 = smov 0  }
  0x1a   :  { %s3178_s25 = smov 0   ;;  %s3180_s26 = smov 0  }
  0x1b   :  { %s3182_s27 = smov 0  }
  0x1c LB: > { %3780 = sst [smem:[#allocation26_spill]] %s3055_s19  ;;  %p67_p0 = scmp.eq.s32.totalorder %s3087_s27, 0  ;;  %s3087_s27 = sphi %s3182_s27, %s40_s27   ;;  %s3083_s26 = sphi %s3180_s26, %s3831_s26   ;;  %s3079_s25 = sphi %s3178_s25, %s3837_s25   ;;  %s3075_s24 = sphi %s3176_s24, %s3829_s24   ;;  %s3071_s23 = sphi %s3174_s23, %s3836_s23   ;;  %s3067_s22 = sphi %s3172_s22, %s3828_s22   ;;  %s3063_s21 = sphi %s3170_s21, %s3835_s21   ;;  %s3059_s20 = sphi %s3168_s20, %s3834_s20   ;;  %s3055_s19 = sphi %s3166_s19, %s3826_s19   ;;  %s3051_s18 = sphi %s3164_s18, %s3833_s18   ;;  %s3047_s17 = sphi %s3162_s17, %s3832_s17  }
  0x1d   : > { %3781 = sst [smem:[#allocation27_spill]] %s3067_s22  ;;  %p92_p1 = scmp.ne.s32.totalorder %s3055_s19, %s3051_s18 }
  0x1e   : > { %3782 = sst [smem:[#allocation28_spill]] %s3071_s23  ;;  %p3763_p2 = scmp.lt.s32.totalorder %s3087_s27, 8 }
  0x1f   : > { %3783 = sst [smem:[#allocation29_spill]] %s3075_s24  ;;  %s3223_s29 = sand.u32 1, %s3087_s27  }
  0x20   : > { %3784 = sst [smem:[#allocation30_spill]] %s3083_s26  ;;  %p94_p3 = por %p92_p1, %p67_p0 }
  0x21   : > { %s3228_s30 = sand.u32 1, %s3055_s19   ;;  %s3785_s1 = sld [smem:[#allocation38_spill]] }
  0x22   : > { %s404_s16 = scalar_lea.vmem [#allocation7], %s3228_s30  ;;  %p3237_p4 = pnand %p3763_p2, %p94_p3 }
  0x23   : > { %s411_s28 = sshll.u32 %s404_s16, 4  ;;  %p2432_p5 = scmp.ge.s32.totalorder %s3087_s27, 1  ;;  %s412_s28 = int_to_ptr.vmem [resolvable:$true] %s411_s28 }
  0x24   : > { %p561_p6 = scmp.lt.s32.totalorder %s3087_s27, 9  ;;  %s3757_s12 = scalar_lea.sflag [#allocation8], %s3223_s29 }
  0x25   : > { %s3789_s3 = sld [smem:[#allocation40_spill]]  ;;  %s438_s11 = scalar_lea.vmem [#allocation10], %s3228_s30 }
  0x26   : > { %p3248_p7 = pnand %p2432_p5, %p561_p6  ;;  %s445_s9 = sshll.u32 %s438_s11, 4  ;;  %s446_s9 = int_to_ptr.vmem [resolvable:$true] %s445_s9 }
  0x27   : > { %s407_s14 = scalar_lea.hbm %s3785_s1, %s3079_s25  ;;  %s3759_s23 = scalar_lea.sflag [#allocation11], %s3223_s29 }
  0x28   : > { %s409_s15 = sshll.u32 %s407_s14, 4  ;;  %s3790_s5 = sld [smem:[#allocation42_spill]]  ;;  %s410_s15 = int_to_ptr.hbm [resolvable:$true] %s409_s15 }
  0x29   : > { %2482 = dma.hbm_to_vmem [thread:$0]  (!%p3237_p4), %s410_s15, 16, %s412_s28, %s3757_s12  }
  0x2a   : > { %s3787_s13 = scalar_select %p3248_p7, 1, 0 }
  0x2b   : > { %s441_s1 = scalar_lea.hbm %s3789_s3, %s3079_s25  ;;  %s477_s16 = scalar_lea.vmem [#allocation13], %s3228_s30 }
  0x2c   : > { %3788 = sst [smem:[#allocation31_spill]] %s3787_s13  ;;  %s443_s24 = sshll.u32 %s441_s1, 4  ;;  %s444_s24 = int_to_ptr.hbm [resolvable:$true] %s443_s24 }
  0x2d   : > { %2488 = dma.hbm_to_vmem [thread:$0]  (!%p3237_p4), %s444_s24, 16, %s446_s9, %s3759_s23  }
  0x2e   : > { %s480_s12 = scalar_lea.hbm %s3790_s5, %s3079_s25  ;;  %s484_s13 = sshll.u32 %s477_s16, 4  ;;  %s485_s13 = int_to_ptr.vmem [resolvable:$true] %s484_s13 }
  0x2f   : > { %s482_s14 = sshll.u32 %s480_s12, 4  ;;  %s3760_s1 = scalar_lea.sflag [#allocation14], %s3223_s29  ;;  %s483_s14 = int_to_ptr.hbm [resolvable:$true] %s482_s14 }
  0x30   : > { %2494 = dma.hbm_to_vmem [thread:$0]  (!%p3237_p4), %s483_s14, 16, %s485_s13, %s3760_s1  }
  0x31   : > { %s2427_s9 = sshll.u32 %s3228_s30, 1  ;;  %s2428_s11 = sshll.u32 %s3079_s25, 1 }
  0x32   : > { %s3791_s7 = sld [smem:[#allocation43_spill]]  ;;  %s517_s15 = scalar_lea.vmem [#allocation16], %s2427_s9 }
  0x33   : > { %s524_s16 = sshll.u32 %s517_s15, 4  ;;  %s3761_s13 = scalar_lea.sflag [#allocation17], %s3223_s29  ;;  %s525_s16 = int_to_ptr.vmem [resolvable:$true] %s524_s16 }
  0x34   : > { %s3762_s14 = smov 16   ;;  %s3090_s1 = smov 1  }
  0x35   : > { %s3285_s9 = sadd.s32 4294967295, %s3087_s27   ;;  %s49_s24 = sadd.s32 1, %s3079_s25 }
  0x36   : > { %p50_p8 = scmp.ge.s32.totalorder %s49_s24, 4  ;;  %s52_s28 = sadd.s32 1, %s3083_s26 }
  0x37   : > { %p66_p9 = scmp.ne.s32.totalorder %s3067_s22, %s3063_s21  ;;  %p72_p11 = scmp.ne.s32.totalorder %s3063_s21, %s3059_s20 }
  0x38   : > { %s521_s12 = scalar_lea.hbm %s3791_s7, %s2428_s11  ;;  %s2416_s11 = sadd.s32 4294967294, %s3087_s27  }
  0x39   : > { %s522_s23 = sshll.u32 %s521_s12, 4  ;;  %s59_s12 = sadd.s32 1, %s3067_s22  ;;  %s523_s23 = int_to_ptr.hbm [resolvable:$true] %s522_s23 }
  0x3a   : > { %2500 = dma.hbm_to_vmem [thread:$0]  (!%p3237_p4), %s523_s23, 32, %s525_s16, %s3761_s13, %s3762_s14, %s3762_s14, %s3090_s1  }
  0x3b   : > { %s3839_s24 = smov (%p50_p8, %s49_s24), 0  ;;  %s3841_s28 = smov (!%p50_p8, %s52_s28), %s3083_s26 }
  0x3c   : > { %3792 = sst [smem:[#allocation32_spill]] %s3839_s24  ;;  %p3301_p10 = por %p67_p0, %p66_p9 }
  0x3d   : > { %p54_p12 = scmp.ge.s32.totalorder %s3841_s28, 2  ;;  %p73_p13 = scmp.eq.s32.totalorder %s3285_s9, 0 }
  0x3e   : > { %s82_s1 = ssub.s32 %s3079_s25, %s3839_s24  ;;  %p98_p1 = scmp.ne.s32.totalorder %s3051_s18, %s3047_s17 }
  0x3f   : > { %s3843_s28 = smov (%p54_p12, %s3841_s28), 0  ;;  %p3317_p3 = por %p73_p13, %p72_p11 }
  0x40   : > { %3794 = sst [smem:[#allocation33_spill]] %s3843_s28  ;;  %p83_p0 = scmp.eq.s32.totalorder %s82_s1, 0 }
  0x41   : > { %s56_s16 = ssub.s32 %s3083_s26, %s3843_s28  ;;  %p3323_p5 = por %p98_p1, %p73_p13 }
  0x42   : > { %p57_p6 = scmp.eq.s32.totalorder %s56_s16, 0  ;;  %p330_p8 = scmp.eq.s32.totalorder %s3285_s9, 7 }
  0x43   : > { %s3797_s14 = sadd.s32 1, %s3055_s19  ;;  %p336_p2 = scmp.eq.s32.totalorder %s2416_s11, 7 }
  0x44   : > { %s3331_s17 = scalar_select %p83_p0, %s3055_s19, %s3797_s14  }
  0x45   : > { %s3334_s3 = scalar_select %p57_p6, %s3067_s22, %s59_s12  }
  0x46   : > { %3798 = sst [smem:[#allocation34_spill]] %s3331_s17  ;;  %p3339_p12 = por %p330_p8, %p66_p9 }
  0x47   : > { %3799 = sst [smem:[#allocation35_spill]] %s3334_s3  ;;  %s382_s1 = sand.u32 1, %s3067_s22  }
  0x48   : > { %s2420_s7 = sshll.u32 %s3083_s26, 3  ;;  %p3348_p13 = por %p336_p2, %p72_p11 }
  0x49   : > { %s2419_s28 = sshll.u32 %s382_s1, 3  ;;  %s3803_s0 = sld [smem:[#allocation37_spill]] }
  0x4a   : > { %s3801_s16 = scalar_select %p3348_p13, 1, 0 }
  0x4b   : > { %s386_s11 = scalar_lea.vmem [#allocation4], %s2419_s28  ;;  %p3804_p9 = scmp.lt.s32.totalorder %s3087_s27, 8 }
  0x4c   : > { %3802 = sst [smem:[#allocation36_spill]] %s3801_s16  ;;  %s394_s22 = sshll.u32 %s386_s11, 4  ;;  %s395_s22 = int_to_ptr.vmem [resolvable:$true] %s394_s22 }
  0x4d   : > { %p2477_p2 = pnand %p3804_p9, %p3301_p10  ;;  %s3805_s2 = sld [smem:[#allocation39_spill]] }
  0x4e   : > { %s383_s24 = scalar_lea.sflag [#allocation5], %s382_s1  ;;  %s2421_s28 = sshll.u32 %s3228_s30, 4 }
  0x4f   : > { %s390_s12 = scalar_lea.hbm %s3803_s0, %s2420_s7  ;;  %s421_s7 = scalar_lea.vmem [#allocation9], %s3228_s30 }
  0x50   : > { %s392_s3 = sshll.u32 %s390_s12, 4  ;;  %s428_s14 = sshll.u32 %s421_s7, 4  ;;  %s393_s3 = int_to_ptr.hbm [resolvable:$true] %s392_s3  ;;  %s429_s14 = int_to_ptr.vmem [resolvable:$true] %s428_s14 }
  0x51   : > { %2479 = dma.hbm_to_vmem [thread:$0]  (!%p2477_p2), %s393_s3, 128, %s395_s22, %s383_s24  }
  0x52   : > { %s3806_s23 = scalar_lea.sflag [#allocation8], %s3223_s29  ;;  %s2453_s12 = sshll.u32 %s3079_s25, 4 }
  0x53   : > { %s424_s19 = scalar_lea.hbm %s3805_s2, %s3079_s25  ;;  %s3807_s4 = sld [smem:[#allocation41_spill]] }
  0x54   : > { %s426_s16 = sshll.u32 %s424_s19, 4  ;;  %s456_s19 = scalar_lea.vmem [#allocation12], %s2421_s28  ;;  %s427_s16 = int_to_ptr.hbm [resolvable:$true] %s426_s16 }
  0x55   : > { %2485 = dma.hbm_to_vmem [thread:$0]  (!%p3237_p4), %s427_s16, 16, %s429_s14, %s3806_s23  }
  0x56   : > { %s464_s3 = sshll.u32 %s456_s19, 4  ;;  %s2424_s17 = sshll.u32 %s3228_s30, 6  ;;  %s465_s3 = int_to_ptr.vmem [resolvable:$true] %s464_s3 }
  0x57   : > { %s3091_s1 = smov 128   ;;  %s3092_s24 = smov 8  }
  0x58   : > { %s3808_s7 = scalar_lea.sflag [#allocation11], %s3223_s29  ;;  %s2454_s16 = sshll.u32 %s3079_s25, 6 }
  0x59   : > { %s461_s26 = scalar_lea.hbm %s3807_s4, %s2453_s12  ;;  %s500_s0 = scalar_lea.hbm %s3748_s6, %s2454_s16 }
  0x5a   : > { %s462_s22 = sshll.u32 %s461_s26, 4  ;;  %s495_s28 = scalar_lea.vmem [#allocation15], %s2424_s17  ;;  %s463_s22 = int_to_ptr.hbm [resolvable:$true] %s462_s22 }
  0x5b   : > { %2491 = dma.hbm_to_vmem [thread:$0]  (!%p3237_p4), %s463_s22, 256, %s465_s3, %s3808_s7, %s3091_s1, %s3091_s1, %s3092_s24  }
  0x5c   : > { %s503_s12 = sshll.u32 %s495_s28, 4  ;;  %s501_s11 = sshll.u32 %s500_s0, 4  ;;  %s504_s12 = int_to_ptr.vmem [resolvable:$true] %s503_s12  ;;  %s502_s11 = int_to_ptr.hbm [resolvable:$true] %s501_s11 }
  0x5d   : > { %s3809_s26 = scalar_lea.sflag [#allocation14], %s3223_s29  ;;  %s543_s2 = scalar_lea.hbm %s3750_s8, %s2454_s16 }
  0x5e   : > { %2497 = dma.hbm_to_vmem [thread:$0]  (!%p3237_p4), %s502_s11, 1024, %s504_s12, %s3809_s26, %s3091_s1, %s3091_s1, %s3092_s24  }
  0x5f   : > { %s538_s3 = scalar_lea.vmem [#allocation18], %s2424_s17  ;;  %s544_s7 = sshll.u32 %s543_s2, 4  ;;  %s545_s7 = int_to_ptr.hbm [resolvable:$true] %s544_s7 }
  0x60   : > { %s546_s22 = sshll.u32 %s538_s3, 4  ;;  %s3093_s4 = smov 256   ;;  %s547_s22 = int_to_ptr.vmem [resolvable:$true] %s546_s22 }
  0x61   : > { %s3810_s14 = smov 16   ;;  %s3811_s23 = scalar_lea.sflag [#allocation17], %s3223_s29 }
  0x62   : > { %2503 = dma.hbm_to_vmem [thread:$0]  (!%p3237_p4), %s545_s7, 1024, %s547_s22, %s3811_s23, %s3093_s4, %s3093_s4, %s3810_s14  }
  0x63   : > { %565 = sbr.rel (%p3248_p7) target bundleno = 1920 (0x780), region = 60  ;;  %s3397_s1 = sand.u32 (!%p3248_p7), 1, %s3063_s21  }
  0x64   : > { %s2433_s17 = sshll.u32 (!%p3248_p7), %s3397_s1, 3  ;;  %s568_s24 = scalar_lea.sflag (!%p3248_p7), [#allocation5], %s3397_s1 }
  0x65   : > { %s3403_s2 = scalar_lea.vmem (!%p3248_p7), [#allocation4], %s2433_s17 }
  0x68   : > { %3022 = dma.done.wait (%p3317_p3), %s568_s24, 128  }
  0x69   : > { %3024 = vsyncadd (%p3317_p3), %s568_s24, 4294967168  ;;  %s577_s4 = sand.u32 1, %s3285_s9   ;;  %s3411_s10 = sand.u32 1, %s3051_s18  }
  0x6a   : > { %s578_s29 = scalar_lea.sflag [#allocation8], %s577_s4 }
  0x6b   : > { %3026 = dma.done.wait (%p3323_p5), %s578_s29, 32  }
  0x6c   : > { %3028 = vsyncadd (%p3323_p5), %s578_s29, 4294967264  ;;  %s596_s15 = scalar_lea.sflag [#allocation11], %s577_s4 }
  0x6d   : > { %3030 = dma.done.wait (%p3323_p5), %s596_s15, 272  }
  0x6e   : > { %3032 = vsyncadd (%p3323_p5), %s596_s15, 4294967024  ;;  %s2434_s9 = sshll.u32 %s3411_s10, 4  ;;  %s615_s26 = scalar_lea.sflag [#allocation14], %s577_s4 }
  0x6f   : > { %s3425_s11 = scalar_lea.vmem [#allocation12], %s2434_s9 }
  0x70   : > { %3034 = dma.done.wait (%p3323_p5), %s615_s26, 1040  }
  0x71   : > { %3036 = vsyncadd (%p3323_p5), %s615_s26, 4294966256  ;;  %s2435_s19 = sshll.u32 %s3411_s10, 6  ;;  %s2436_s3 = sshll.u32 %s3411_s10, 1 }
  0x72   : > { %s3434_s22 = scalar_lea.vmem [#allocation15], %s2435_s19  ;;  %s634_s7 = scalar_lea.sflag [#allocation17], %s577_s4 }
  0x73   : > { %s3436_s14 = scalar_lea.vmem [#allocation16], %s2436_s3 }
  0x74   : > { %3038 = dma.done.wait (%p3323_p5), %s634_s7, 1056  }
  0x75   : > { %3040 = vsyncadd (%p3323_p5), %s634_s7, 4294966240  ;;  %s3813_s23 = sld [smem:[#allocation28_spill]]  ;;  %s3456_s16 = scalar_lea.vmem [#allocation18], %s2435_s19 }
  0x76   : > { %s3814_s0 = sld [smem:[#allocation29_spill]]  ;;  %s3460_s28 = scalar_lea.vmem [#allocation19], %s2433_s17 }
  0x77   : > { %s3815_s4 = sld [smem:[#allocation44_spill]] }
  0x78   : > { %s3816_s13 = sld [smem:[#allocation46_spill]] }
  0x7b   : > { %p731_p4 = scmp.lt.s32.totalorder %s3813_s23, 3  ;;  %p2441_p10 = scmp.ne.s32.totalorder %s3813_s23, 0 }
  0x7c   : > { %p735_p7 = scmp.lt.s32.totalorder %s3814_s0, 1 }
  0x7d   : > { %s732_s24 = scalar_select %p731_p4, %s3813_s23, 3 }
  0x7e   : > { %s3845_s0 = smov (!%p735_p7, %s3814_s0), 1  ;;  %742 = sbr.rel (%p2441_p10) target bundleno = 134 (0x86), region = 100 }
  0x7f   : > { %s2439_s29 = sshll.u32 %s732_s24, 1  ;;  %s2440_s3 = sshll.u32 %s3845_s0, 3 }
  0x80   : > { %s3449_s26 = scalar_lea.vmem %s3815_s4, %s2439_s29  ;;  %s3454_s7 = scalar_lea.vmem %s3816_s13, %s2440_s3 }
  0x83   : > { %v743_v0 = vld [vmem:[%s3403_s2] sm:$0xff]  ;;  %vm744_vm0 = vcmask 130048   ;;  %vm746_vm1 = vcmask 7168   ;;  %v3094_v1 = vmov 0.0  }
  0x84   : > { %745 = vst.msk [vmem:[#allocation2] sm:$0xff] %vm744_vm0, %v743_v0 }
  0x85   : > { %747 = vst.msk [vmem:[#allocation3] sm:$0xff] %vm746_vm1, %v3094_v1 }
  0x86 PF: > { %v763_v2 = vld [vmem:[%s3425_s11 + $0x8] sm:$0xff]  ;;  %v762_v3 = vld [vmem:[%s3425_s11] sm:$0xff]  ;;  %s3817_s17 = scalar_lea.vmem [#allocation9], %s3411_s10  ;;  %s3818_s12 = scalar_lea.vmem [#allocation7], %s3411_s10  ;;  %vm768_vm3 = vcmask 130048   ;;  %vm942_vm5 = vcmask 261120  }
  0x87   : > { %v786_v5 = vand.u32 4294901760, %v763_v2  ;;  %v788_v6 = vand.u32 4294901760, %v762_v3  ;;  %v2611_v7 = vld [vmem:[%s3817_s17] ss:$0 sm:$0xff]  ;;  %v936_v29 = vld [vmem:[%s3434_s22 + $0x10] sm:$0xff]  ;;  %v935_v32 = vld [vmem:[%s3434_s22 + $0x8] sm:$0xff] }
  0x88   : > { %v2612_v8 = vld [vmem:[%s3818_s12] ss:$0 sm:$0xff]  ;;  %v960_v31 = vand.u32 4294901760, %v936_v29  ;;  %v962_v35 = vand.u32 4294901760, %v935_v32  ;;  %v934_v36 = vld [vmem:[%s3434_s22] sm:$0xff]  ;;  %s3819_s2 = scalar_lea.vmem [#allocation13], %s3411_s10 }
  0x89   : > { %v814_v9 = vsub.f32 %v763_v2, %v786_v5  ;;  %787 = vmatpush.msra.mxu0 %v786_v5  ;;  %v820_v10 = vsub.f32 %v762_v3, %v788_v6  ;;  %871 = vmatpush.msra.mxu3 %v786_v5  ;;  %v937_v27 = vld [vmem:[%s3434_s22 + $0x18] sm:$0xff]  ;;  %v964_v40 = vand.u32 4294901760, %v934_v36  ;;  %s3096_s11 = smov 112   ;;  %s3097_s30 = smov 96   ;;  %vm2111_vm13 = vcmask 7168  }
  0x8a   : > { %v958_v28 = vand.u32 4294901760, %v937_v27  ;;  %v994_v34 = vsub.f32 %v936_v29, %v960_v31  ;;  %v1000_v39 = vsub.f32 %v935_v32, %v962_v35  ;;  %v2613_v51 = vld [vmem:[%s3819_s2] ss:$0 sm:$0xff]  ;;  %s3098_s19 = smov 16   ;;  %s3101_s23 = smov 64  }
  0x8b   : > { %v748_v4 = vld [vmem:[#allocation2] sm:$0xff]  ;;  %846 = vmatpush.msra.mxu2 %v814_v9  ;;  %789 = vmatpush.msra.mxu0 %v788_v6  ;;  %v815_v12 = vand.u32 4294901760, %v814_v9  ;;  %v821_v13 = vand.u32 4294901760, %v820_v10  ;;  %v1006_v44 = vsub.f32 %v934_v36, %v964_v40  ;;  %s3820_s0 = scalar_lea.vmem [#allocation10], %s3411_s10  ;;  %s3821_s24 = sld [smem:[#allocation28_spill]] }
  0x8c   : > { %v754_v11 = vadd.f32 %v2611_v7, %v748_v4  ;;  %873 = vmatpush.msra.mxu3 %v788_v6  ;;  %v988_v30 = vsub.f32 %v937_v27, %v958_v28  ;;  %v995_v38 = vand.u32 4294901760, %v994_v34  ;;  %v1001_v43 = vand.u32 4294901760, %v1000_v39 }
  0x8d   : > { %849 = vmatpush.msra.mxu2 %v820_v10  ;;  %v816_v15 = vsub.f32 %v814_v9, %v815_v12  ;;  %898 = vmatpush.msrb.mxu0 %v815_v12  ;;  %v822_v16 = vsub.f32 %v820_v10, %v821_v13  ;;  %v1007_v47 = vand.u32 4294901760, %v1006_v44  ;;  %v2444_v10 = vld [vmem:[%s3434_s22 + $0x30] sm:$0xff] }
  0x8e   : > { %v758_v14 = vmul.f32 %v2612_v8, %v754_v11  ;;  %v989_v33 = vand.u32 4294901760, %v988_v30  ;;  %v996_v42 = vsub.f32 %v994_v34, %v995_v38  ;;  %v1002_v46 = vsub.f32 %v1000_v39, %v1001_v43  ;;  %v2445_v8 = vld [vmem:[%s3434_s22 + $0x38] sm:$0xff] }
  0x8f   : > { %v817_v18 = vand.u32 4294901760, %v816_v15  ;;  %v823_v19 = vand.u32 4294901760, %v822_v16  ;;  %902 = vmatpush.msrb.mxu0 %v821_v13  ;;  %959 = vmatpush.msrb.mxu2 %v958_v28  ;;  %v1008_v49 = vsub.f32 %v1006_v44, %v1007_v47  ;;  %v1160_v9 = vand.u32 4294901760, %v2445_v8  ;;  %v2443_v13 = vld [vmem:[%s3434_s22 + $0x28] sm:$0xff] }
  0x90   : > { %vm759_vm2 = vcmp.ge.f32.partialorder %v758_v14, 0.0  ;;  %v760_v17 = vmul.f32 0.9, %v758_v14  ;;  %v990_v37 = vsub.f32 %v988_v30, %v989_v33  ;;  %v997_v45 = vand.u32 4294901760, %v996_v42 }
  0x91   : > { %818 = vmatpush.msra.mxu1 %v817_v18  ;;  %961 = vmatpush.msrb.mxu2 %v960_v31  ;;  %v1003_v48 = vand.u32 4294901760, %v1002_v46  ;;  %v1009_v50 = vand.u32 4294901760, %v1008_v49  ;;  %v1190_v11 = vsub.f32 %v2445_v8, %v1160_v9  ;;  %v1162_v12 = vand.u32 4294901760, %v2444_v10  ;;  %p2448_p11 = scmp.ne.s32.totalorder %s3821_s24, 3 }
  0x92   : > { %v3470_v20 = vsel %vm759_vm2, %v758_v14, %v760_v17  ;;  %v991_v41 = vand.u32 4294901760, %v990_v37  ;;  %v1164_v16 = vand.u32 4294901760, %v2443_v13  ;;  %v2442_v17 = vld [vmem:[%s3434_s22 + $0x20] sm:$0xff]  ;;  %s3099_s22 = smov 32  }
  0x93   : > { %v770_v21 = vsel %vm768_vm3, %v3470_v20, 0  ;;  %824 = vmatpush.msra.mxu1 %v823_v19  ;;  %963 = vmatpush.msrb.mxu2 %v962_v35  ;;  %v1191_v14 = vand.u32 4294901760, %v1190_v11  ;;  %v1196_v15 = vsub.f32 %v2444_v10, %v1162_v12 }
  0x94   : > { %v790_v22 = vand.u32 4294901760, %v770_v21  ;;  %992 = vmatpush.msrb.mxu3 %v991_v41 }
  0x95   : > { %923 = vmatpush.msrb.mxu1 %v786_v5  ;;  %965 = vmatpush.msrb.mxu2 %v964_v40  ;;  %v1192_v18 = vsub.f32 %v1190_v11, %v1191_v14  ;;  %v1197_v19 = vand.u32 4294901760, %v1196_v15 }
  0x96   : > { %v791_v23 = vsub.f32 %v770_v21, %v790_v22  ;;  %826 = vmatmul.f32.vlgmr.msra.gmra.mxu1 %v790_v22  ;;  %998 = vmatpush.msrb.mxu3 %v997_v45  ;;  %v1202_v21 = vsub.f32 %v2443_v13, %v1164_v16 }
  0x97   : > { %925 = vmatpush.msrb.mxu1 %v788_v6 }
  0x98   : > { %852 = vmatmul.f32.vlgmr.msra.gmra.mxu2 %v791_v23  ;;  %v792_v24 = vand.u32 4294901760, %v791_v23  ;;  %1004 = vmatpush.msrb.mxu3 %v1003_v48 }
  0x99   : > { %1059 = vmatpush.msra.mxu1 %v958_v28  ;;  %1088 = vmatpush.msra.mxu2 %v989_v33  ;;  %v2614_v33 = vld [vmem:[%s3436_s14] ss:$0 sm:$0xff] }
  0x9a   : > { %v793_v25 = vsub.f32 %v791_v23, %v792_v24  ;;  %877 = vmatmul.f32.vlgmr.msra.gmra.mxu3 %v792_v24  ;;  %v1193_v23 = vand.u32 4294901760, %v1192_v18  ;;  %v1198_v24 = vsub.f32 %v1196_v15, %v1197_v19 }
  0x9b   : > { %1061 = vmatpush.msra.mxu1 %v960_v31  ;;  %1092 = vmatpush.msra.mxu2 %v995_v38 }
  0x9c   : > { %v794_v26 = vand.u32 4294901760, %v793_v25  ;;  %1010 = vmatpush.msrb.mxu3 %v1009_v50  ;;  %v1203_v25 = vand.u32 4294901760, %v1202_v21  ;;  %v1199_v27 = vand.u32 4294901760, %v1198_v24 }
  0x9d   : > { %1063 = vmatpush.msra.mxu1 %v962_v35  ;;  %1096 = vmatpush.msra.mxu2 %v1001_v43 }
  0x9e   : > { %795 = vmatmul.f32.vlgmr.msra.gmra.mxu0 %v794_v26  ;;  %927 = vmatmul.f32.vlgmr.msrb.gmra.mxu1 %v790_v22 }
  0x9f   : > { %1030 = vmatpush.msra.mxu0 %v988_v30  ;;  %1065 = vmatpush.msra.mxu1 %v964_v40 }
  0xa0   : > { %1119 = vmatpush.msra.mxu3 %v958_v28  ;;  %1100 = vmatpush.msra.mxu2 %v1007_v47  ;;  %v1204_v28 = vsub.f32 %v1202_v21, %v1203_v25 }
  0xa1   : > { %1033 = vmatpush.msra.mxu0 %v994_v34  ;;  %1194 = vmatpush.msrb.mxu1 %v1193_v23 }
  0xa2   : > { %1121 = vmatpush.msra.mxu3 %v960_v31  ;;  %v1205_v30 = vand.u32 4294901760, %v1204_v28 }
  0xa3   : > { %1036 = vmatpush.msra.mxu0 %v1000_v39  ;;  %1200 = vmatpush.msrb.mxu1 %v1199_v27 }
  0xa4   : > { %1123 = vmatpush.msra.mxu3 %v962_v35 }
  0xa5   : > { %1039 = vmatpush.msra.mxu0 %v1006_v44  ;;  %1206 = vmatpush.msrb.mxu1 %v1205_v30 }
  0xa6   : > { %904 = vmatmul.f32.vlgmr.msrb.gmra.mxu0 %v790_v22  ;;  %1125 = vmatpush.msra.mxu3 %v964_v40  ;;  %v1166_v22 = vand.u32 4294901760, %v2442_v17 }
  0xa7   : > { %1161 = vmatpush.msrb.mxu0 %v1160_v9 }
  0xa8   : > { %v1208_v26 = vsub.f32 %v2442_v17, %v1166_v22 }
  0xa9   : > { %1163 = vmatpush.msrb.mxu0 %v1162_v12 }
  0xaa   : > { %v1209_v29 = vand.u32 4294901760, %v1208_v26 }
  0xab   : > { %1165 = vmatpush.msrb.mxu0 %v1164_v16 }
  0xac   : > { %v1210_v31 = vsub.f32 %v1208_v26, %v1209_v29 }
  0xad   : > { %1167 = vmatpush.msrb.mxu0 %v1166_v22 }
  0xae   : > { %v1211_v32 = vand.u32 4294901760, %v1210_v31 }
  0xb0   : > { %1212 = vmatpush.msrb.mxu1 %v1211_v32 }
 0x113   : > { %v827_v52 = vpop.f32.mrf.mxu1 }
 0x11b   : > { %v796_v53 = vpop.f32.mrf.mxu0  ;;  %v853_v55 = vpop.f32.mrf.mxu2 }
 0x11c   : > { %v797_v54 = vadd.f32 %v2613_v51, %v796_v53  ;;  %v928_v61 = vpop.f32.mrf.mxu1 }
 0x11d   : > { %v878_v57 = vpop.f32.mrf.mxu3 }
 0x11e   : > { %v828_v56 = vadd.f32 %v827_v52, %v797_v54 }
 0x120   : > { %v854_v58 = vadd.f32 %v853_v55, %v828_v56  ;;  %v1343_v55 = vld [vmem:[%s3456_s16 + $0x30] sm:$0xff] }
 0x121   : > { %v1366_v56 = vand.u32 4294901760, %v1343_v55 }
 0x122   : > { %v879_v59 = vadd.f32 %v878_v57, %v854_v58  ;;  %v1341_v57 = vld [vmem:[%s3456_s16 + $0x20] sm:$0xff] }
 0x123   : > { %v905_v60 = vpop.f32.mrf.mxu0  ;;  %v1396_v58 = vsub.f32 %v1343_v55, %v1366_v56 }
 0x124   : > { %v906_v62 = vadd.f32 %v905_v60, %v879_v59  ;;  %v1368_v59 = vand.u32 4294901760, %v1341_v57  ;;  %v1339_v60 = vld [vmem:[%s3456_s16 + $0x10] sm:$0xff] }
 0x126   : > { %v929_v63 = vadd.f32 %v928_v61, %v906_v62  ;;  %v1397_v61 = vand.u32 4294901760, %v1396_v58  ;;  %v1402_v62 = vsub.f32 %v1341_v57, %v1368_v59 }
 0x128   : > { %vm931_vm4 = vcmp.ge.f32.partialorder %v929_v63, 0.0  ;;  %v932_v0 = vmul.f32 0.01, %v929_v63 }
 0x12a   : > { %v3480_v1 = vsel %vm931_vm4, %v929_v63, %v932_v0  ;;  %v1370_v63 = vand.u32 4294901760, %v1339_v60  ;;  %v1337_v0 = vld [vmem:[%s3456_s16] sm:$0xff] }
 0x12b   : > { %v944_v2 = vsel %vm942_vm5, %v3480_v1, 0 }
 0x12c   : > { %v966_v3 = vand.u32 4294901760, %v944_v2 }
 0x12e   : > { %v967_v4 = vsub.f32 %v944_v2, %v966_v3  ;;  %1012 = vmatmul.f32.vlgmr.msrb.gmra.mxu3 %v966_v3  ;;  %v1403_v2 = vand.u32 4294901760, %v1402_v62 }
 0x12f   : > { %1261 = vmatpush.msrb.mxu3 %v1160_v9 }
 0x130   : > { %1042 = vmatmul.f32.vlgmr.msra.gmra.mxu0 %v967_v4  ;;  %v968_v5 = vand.u32 4294901760, %v967_v4 }
 0x131   : > { %1263 = vmatpush.msrb.mxu3 %v1162_v12  ;;  %1290 = vmatpush.msra.mxu0 %v1191_v14 }
 0x132   : > { %1069 = vmatmul.f32.vlgmr.msra.gmra.mxu1 %v968_v5  ;;  %v969_v6 = vsub.f32 %v967_v4, %v968_v5  ;;  %v1372_v4 = vand.u32 4294901760, %v1337_v0 }
 0x133   : > { %1265 = vmatpush.msrb.mxu3 %v1164_v16  ;;  %1294 = vmatpush.msra.mxu0 %v1197_v19 }
 0x134   : > { %v970_v7 = vand.u32 4294901760, %v969_v6  ;;  %1321 = vmatpush.msra.mxu1 %v1160_v9  ;;  %v1404_v6 = vsub.f32 %v1402_v62, %v1403_v2  ;;  %v1414_v8 = vsub.f32 %v1337_v0, %v1372_v4 }
 0x135   : > { %1267 = vmatpush.msrb.mxu3 %v1166_v22  ;;  %1298 = vmatpush.msra.mxu0 %v1203_v25  ;;  %v1338_v25 = vld [vmem:[%s3456_s16 + $0x8] sm:$0xff] }
 0x136   : > { %971 = vmatmul.f32.vlgmr.msrb.gmra.mxu2 %v970_v7  ;;  %1127 = vmatmul.f32.vlgmr.msra.gmra.mxu3 %v966_v3  ;;  %v1405_v9 = vand.u32 4294901760, %v1404_v6  ;;  %v1557_v28 = vand.u32 4294901760, %v1338_v25 }
 0x137   : > { %1232 = vmatpush.msrb.mxu2 %v1190_v11  ;;  %1302 = vmatpush.msra.mxu0 %v1209_v29  ;;  %v1415_v11 = vand.u32 4294901760, %v1414_v8 }
 0x138   : > { %1323 = vmatpush.msra.mxu1 %v1162_v12  ;;  %v1344_v12 = vld [vmem:[%s3456_s16 + $0x38] sm:$0xff] }
 0x139   : > { %1235 = vmatpush.msrb.mxu2 %v1196_v15  ;;  %v1416_v14 = vsub.f32 %v1414_v8, %v1415_v11  ;;  %v3499_v15 = vand.u32 4294901760, %v1344_v12 }
 0x13a   : > { %1325 = vmatpush.msra.mxu1 %v1164_v16  ;;  %v1342_v16 = vld [vmem:[%s3456_s16 + $0x28] sm:$0xff] }
 0x13b   : > { %1238 = vmatpush.msrb.mxu2 %v1202_v21  ;;  %v1417_v17 = vand.u32 4294901760, %v1416_v14  ;;  %v3504_v18 = vsub.f32 %v1344_v12, %v3499_v15  ;;  %v3506_v19 = vand.u32 4294901760, %v1342_v16  ;;  %v1340_v21 = vld [vmem:[%s3456_s16 + $0x18] sm:$0xff]  ;;  %s3095_s16 = smov 80  }
 0x13c   : > { %1327 = vmatpush.msra.mxu1 %v1166_v22  ;;  %v3511_v23 = vand.u32 4294901760, %v1340_v21 }
 0x13d   : > { %1241 = vmatpush.msrb.mxu2 %v1208_v26  ;;  %v1582_v22 = vand.u32 4294901760, %v3504_v18  ;;  %v3514_v24 = vsub.f32 %v1342_v16, %v3506_v19 }
 0x13e   : > { %1102 = vmatmul.f32.vlgmr.msra.gmra.mxu2 %v966_v3  ;;  %v1408_v3 = vsub.f32 %v1339_v60, %v1370_v63  ;;  %v1593_v29 = vsub.f32 %v1340_v21, %v3511_v23 }
 0x13f   : > { %1367 = vmatpush.msra.mxu2 %v1366_v56  ;;  %v1583_v26 = vsub.f32 %v3504_v18, %v1582_v22  ;;  %v1588_v27 = vand.u32 4294901760, %v3514_v24 }
 0x140   : > { %v1409_v7 = vand.u32 4294901760, %v1408_v3  ;;  %v1594_v32 = vand.u32 4294901760, %v1593_v29 }
 0x141   : > { %1369 = vmatpush.msra.mxu2 %v1368_v59  ;;  %v1584_v30 = vand.u32 4294901760, %v1583_v26  ;;  %v1589_v31 = vsub.f32 %v3514_v24, %v1588_v27 }
 0x142   : > { %v1410_v10 = vsub.f32 %v1408_v3, %v1409_v7 }
 0x143   : > { %1371 = vmatpush.msra.mxu2 %v1370_v63 }
 0x144   : > { %v1411_v13 = vand.u32 4294901760, %v1410_v10 }
 0x145   : > { %1373 = vmatpush.msra.mxu2 %v1372_v4 }
 0x1ad   : > { %v1043_v38 = vpop.f32.mrf.mxu0 }
 0x1af   : > { %v1070_v40 = vpop.f32.mrf.mxu1 }
 0x1b1   : > { %v1013_v34 = vpop.f32.mrf.mxu3 }
 0x1b9   : > { %v972_v35 = vpop.f32.mrf.mxu2  ;;  %v1128_v44 = vpop.f32.mrf.mxu3 }
 0x1ba   : > { %v973_v36 = vadd.f32 %v2614_v33, %v972_v35  ;;  %v1599_v33 = vsub.f32 %v1338_v25, %v1557_v28  ;;  %v1595_v35 = vsub.f32 %v1593_v29, %v1594_v32 }
 0x1bc   : > { %v1014_v37 = vadd.f32 %v1013_v34, %v973_v36  ;;  %v1590_v34 = vand.u32 4294901760, %v1589_v31  ;;  %v1600_v36 = vand.u32 4294901760, %v1599_v33 }
 0x1be   : > { %v1044_v39 = vadd.f32 %v1043_v38, %v1014_v37  ;;  %v2615_v37 = vld [vmem:[%s3436_s14 + $0x1] ss:$0 sm:$0xff]  ;;  %v1596_v38 = vand.u32 4294901760, %v1595_v35  ;;  %s3100_s14 = smov 48  }
 0x1c0   : > { %v1071_v41 = vadd.f32 %v1070_v40, %v1044_v39  ;;  %v1601_v39 = vsub.f32 %v1599_v33, %v1600_v36 }
 0x1c1   : > { %v1103_v42 = vpop.f32.mrf.mxu2 }
 0x1c2   : > { %v1104_v43 = vadd.f32 %v1103_v42, %v1071_v41  ;;  %v1602_v40 = vand.u32 4294901760, %v1601_v39 }
 0x1c4   : > { %v1129_v45 = vadd.f32 %v1128_v44, %v1104_v43 }
 0x1c6   : > { %vm1131_vm6 = vcmp.ge.f32.partialorder %v1129_v45, 0.0  ;;  %v1132_v46 = vmul.f32 0.01, %v1129_v45 }
 0x1c8   : > { %v1133_v47 = vsel %vm1131_vm6, %v1129_v45, %v1132_v46 }
 0x1c9   : > { %v3490_v48 = vadd.f32 %v1133_v47, %v3480_v1  ;;  %v1398_v1 = vsub.f32 %v1396_v58, %v1397_v61 }
 0x1cb   : > { %v1146_v49 = vsel %vm942_vm5, %v3490_v48, 0  ;;  %v1399_v5 = vand.u32 4294901760, %v1398_v1 }
 0x1cc   : > { %v1168_v50 = vand.u32 4294901760, %v1146_v49 }
 0x1cd   : > { %1400 = vmatpush.msra.mxu3 %v1399_v5 }
 0x1ce   : > { %1214 = vmatmul.f32.vlgmr.msrb.gmra.mxu1 %v1168_v50  ;;  %v1169_v51 = vsub.f32 %v1146_v49, %v1168_v50 }
 0x1cf   : > { %1467 = vmatpush.msrb.mxu1 %v1366_v56  ;;  %1406 = vmatpush.msra.mxu3 %v1405_v9 }
 0x1d0   : > { %1244 = vmatmul.f32.vlgmr.msrb.gmra.mxu2 %v1169_v51  ;;  %v1170_v52 = vand.u32 4294901760, %v1169_v51 }
 0x1d1   : > { %1469 = vmatpush.msrb.mxu1 %v1368_v59  ;;  %1496 = vmatpush.msrb.mxu2 %v1397_v61 }
 0x1d2   : > { %1271 = vmatmul.f32.vlgmr.msrb.gmra.mxu3 %v1170_v52  ;;  %v1171_v53 = vsub.f32 %v1169_v51, %v1170_v52 }
 0x1d3   : > { %1471 = vmatpush.msrb.mxu1 %v1370_v63  ;;  %1500 = vmatpush.msrb.mxu2 %v1403_v2 }
 0x1d4   : > { %v1172_v54 = vand.u32 4294901760, %v1171_v53  ;;  %1412 = vmatpush.msra.mxu3 %v1411_v13 }
 0x1d5   : > { %1473 = vmatpush.msrb.mxu1 %v1372_v4  ;;  %1504 = vmatpush.msrb.mxu2 %v1409_v7 }
 0x1d6   : > { %1173 = vmatmul.f32.vlgmr.msrb.gmra.mxu0 %v1172_v54  ;;  %1329 = vmatmul.f32.vlgmr.msra.gmra.mxu1 %v1168_v50 }
 0x1d7   : > { %1438 = vmatpush.msrb.mxu0 %v1396_v58  ;;  %1418 = vmatpush.msra.mxu3 %v1417_v17 }
 0x1d8   : > { %1508 = vmatpush.msrb.mxu2 %v1415_v11  ;;  %1585 = vmatpush.msra.mxu1 %v1584_v30 }
 0x1d9   : > { %1441 = vmatpush.msrb.mxu0 %v1402_v62  ;;  %1527 = vmatpush.msrb.mxu3 %v1366_v56 }
 0x1da   : > { %1591 = vmatpush.msra.mxu1 %v1590_v34 }
 0x1db   : > { %1444 = vmatpush.msrb.mxu0 %v1408_v3  ;;  %1529 = vmatpush.msrb.mxu3 %v1368_v59 }
 0x1dc   : > { %1597 = vmatpush.msra.mxu1 %v1596_v38 }
 0x1dd   : > { %1447 = vmatpush.msrb.mxu0 %v1414_v8  ;;  %1531 = vmatpush.msrb.mxu3 %v1370_v63 }
 0x1de   : > { %1304 = vmatmul.f32.vlgmr.msra.gmra.mxu0 %v1168_v50  ;;  %1603 = vmatpush.msra.mxu1 %v1602_v40 }
 0x1df   : > { %1552 = vmatpush.msra.mxu0 %v3499_v15  ;;  %1533 = vmatpush.msrb.mxu3 %v1372_v4 }
 0x1e1   : > { %1554 = vmatpush.msra.mxu0 %v3506_v19 }
 0x1e3   : > { %1556 = vmatpush.msra.mxu0 %v3511_v23 }
 0x1e5   : > { %1558 = vmatpush.msra.mxu0 %v1557_v28 }
 0x24b   : > { %v1215_v41 = vpop.f32.mrf.mxu1 }
 0x253   : > { %v1174_v42 = vpop.f32.mrf.mxu0  ;;  %v1245_v45 = vpop.f32.mrf.mxu2 }
 0x254   : > { %v1175_v43 = vadd.f32 %v2615_v37, %v1174_v42  ;;  %v1330_v52 = vpop.f32.mrf.mxu1 }
 0x255   : > { %v1272_v47 = vpop.f32.mrf.mxu3 }
 0x256   : > { %v1216_v44 = vadd.f32 %v1215_v41, %v1175_v43 }
 0x258   : > { %v1246_v46 = vadd.f32 %v1245_v45, %v1216_v44 }
 0x25a   : > { %v1273_v49 = vadd.f32 %v1272_v47, %v1246_v46 }
 0x25b   : > { %v1305_v50 = vpop.f32.mrf.mxu0 }
 0x25c   : > { %v1306_v51 = vadd.f32 %v1305_v50, %v1273_v49 }
 0x25e   : > { %v1331_v53 = vadd.f32 %v1330_v52, %v1306_v51 }
 0x260   : > { %vm1333_vm7 = vcmp.ge.f32.partialorder %v1331_v53, 0.0  ;;  %v1334_v54 = vmul.f32 0.01, %v1331_v53 }
 0x262   : > { %v1335_v55 = vsel %vm1333_vm7, %v1331_v53, %v1334_v54 }
 0x263   : > { %v1336_v56 = vadd.f32 %v1335_v55, %v3490_v48  ;;  %v1345_v48 = vld [vmem:[%s3449_s26] sm:$0x3] }
 0x264   : > { %v1347_v63 = vperm.slane %v1345_v48, 0  ;;  %v1348_v12 = vperm.slane %v1345_v48, 1 }
 0x265   : > { %v1352_v57 = vsel %vm942_vm5, %v1336_v56, 0 }
 0x266   : > { %v1374_v58 = vand.u32 4294901760, %v1352_v57 }
 0x268   : > { %1420 = vmatmul.f32.vlgmr.msra.gmra.mxu3 %v1374_v58  ;;  %v1375_v59 = vsub.f32 %v1352_v57, %v1374_v58 }
 0x269   : > { %1652 = vmatpush.msra.mxu3 %v3499_v15 }
 0x26a   : > { %1450 = vmatmul.f32.vlgmr.msrb.gmra.mxu0 %v1375_v59  ;;  %v1376_v60 = vand.u32 4294901760, %v1375_v59 }
 0x26b   : > { %1654 = vmatpush.msra.mxu3 %v3506_v19  ;;  %1681 = vmatpush.msrb.mxu0 %v1582_v22 }
 0x26c   : > { %1477 = vmatmul.f32.vlgmr.msrb.gmra.mxu1 %v1376_v60  ;;  %v1377_v61 = vsub.f32 %v1375_v59, %v1376_v60 }
 0x26d   : > { %1656 = vmatpush.msra.mxu3 %v3511_v23  ;;  %1685 = vmatpush.msrb.mxu0 %v1588_v27 }
 0x26e   : > { %v1378_v62 = vand.u32 4294901760, %v1377_v61  ;;  %1712 = vmatpush.msrb.mxu1 %v3499_v15 }
 0x26f   : > { %1658 = vmatpush.msra.mxu3 %v1557_v28  ;;  %1689 = vmatpush.msrb.mxu0 %v1594_v32 }
 0x270   : > { %1379 = vmatmul.f32.vlgmr.msra.gmra.mxu2 %v1378_v62  ;;  %1535 = vmatmul.f32.vlgmr.msrb.gmra.mxu3 %v1374_v58 }
 0x271   : > { %1714 = vmatpush.msrb.mxu1 %v3506_v19  ;;  %1623 = vmatpush.msra.mxu2 %v3504_v18 }
 0x272   : > { %1564 = vmatmul.f32.vlgmr.msra.gmra.mxu0 %v1378_v62 }
 0x273   : > { %1693 = vmatpush.msrb.mxu0 %v1600_v36  ;;  %1716 = vmatpush.msrb.mxu1 %v3511_v23 }
 0x274   : > { %1605 = vmatmul.f32.vlgmr.msra.gmra.mxu1 %v1374_v58  ;;  %1626 = vmatpush.msra.mxu2 %v3514_v24 }
 0x275   : > { %1718 = vmatpush.msrb.mxu1 %v1557_v28 }
 0x276   : > { %1629 = vmatpush.msra.mxu2 %v1593_v29 }
 0x278   : > { %1510 = vmatmul.f32.vlgmr.msrb.gmra.mxu2 %v1374_v58  ;;  %1662 = vmatmul.f32.vlgmr.msra.gmra.mxu3 %v1376_v60 }
 0x279   : > { %1632 = vmatpush.msra.mxu2 %v1599_v33 }
 0x27a   : > { %1695 = vmatmul.f32.vlgmr.msrb.gmra.mxu0 %v1374_v58 }
 0x27c   : > { %1720 = vmatmul.f32.vlgmr.msrb.gmra.mxu1 %v1374_v58 }
 0x280   : > { %1635 = vmatmul.f32.vlgmr.msra.gmra.mxu2 %v1375_v59 }
 0x2e7   : > { %v1451_v4 = vpop.f32.mrf.mxu0 }
 0x2e9   : > { %v1478_v6 = vpop.f32.mrf.mxu1 }
 0x2eb   : > { %v1421_v0 = vpop.f32.mrf.mxu3 }
 0x2ef   : > { %v1565_v13 = vpop.f32.mrf.mxu0 }
 0x2f0   : > { %v1566_v14 = vadd.f32 %v1565_v13, %v1348_v12 }
 0x2f1   : > { %v1606_v15 = vpop.f32.mrf.mxu1 }
 0x2f2   : > { %v1607_v17 = vadd.f32 %v1606_v15, %v1566_v14 }
 0x2f3   : > { %v1380_v1 = vpop.f32.mrf.mxu2  ;;  %v1536_v10 = vpop.f32.mrf.mxu3 }
 0x2f4   : > { %v1381_v2 = vadd.f32 %v1380_v1, %v1347_v63 }
 0x2f6   : > { %v1422_v3 = vadd.f32 %v1421_v0, %v1381_v2 }
 0x2f7   : > { %v1696_v22 = vpop.f32.mrf.mxu0 }
 0x2f8   : > { %v1452_v5 = vadd.f32 %v1451_v4, %v1422_v3 }
 0x2f9   : > { %v1721_v24 = vpop.f32.mrf.mxu1 }
 0x2fa   : > { %v1479_v7 = vadd.f32 %v1478_v6, %v1452_v5 }
 0x2fb   : > { %v1511_v8 = vpop.f32.mrf.mxu2  ;;  %v1663_v19 = vpop.f32.mrf.mxu3 }
 0x2fc   : > { %v1512_v9 = vadd.f32 %v1511_v8, %v1479_v7 }
 0x2fe   : > { %v3534_v11 = vadd.f32 %v1536_v10, %v1512_v9 }
 0x300   : > { %1734 = vrot.lane.b32.xlu1 %v3534_v11, %s3095_s16  ;;  %1726 = vrot.lane.b32.xlu0 %v3534_v11, %s3096_s11 }
 0x303   : > { %v1636_v16 = vpop.f32.mrf.mxu2 }
 0x304   : > { %v1637_v18 = vadd.f32 %v1636_v16, %v1607_v17 }
 0x306   : > { %v1664_v21 = vadd.f32 %v1663_v19, %v1637_v18 }
 0x308   : > { %1730 = vrot.lane.b32.xlu0 %v3534_v11, %s3097_s30  ;;  %v1697_v23 = vadd.f32 %v1696_v22, %v1664_v21 }
 0x30a   : > { %v3544_v25 = vadd.f32 %v1721_v24, %v1697_v23 }
 0x30c   : > { %v1784_v27 = vsub.f32 0.0, %v3544_v25  ;;  %v1863_v1 = vsub.f32 %v3470_v20, %v3544_v25 }
 0x30e   : > { %v1785_v32 = vmul.f32 1.442695, %v1784_v27 }
 0x310   : > { %1824 = vrot.lane.b32.xlu0 %v3534_v11, %s3098_s19  ;;  %2617 = vpow2.f32 %v1785_v32 }
 0x316   : > { %v2618_v34 = vpop.eup %2617 }
 0x318   : > { %1900 = vrot.lane.b32.xlu0 %v3544_v25, %s3096_s11 }
 0x372   : > { %v1727_v26 = vpop.permute.xlu0 %1726  ;;  %v1735_v31 = vpop.permute.xlu1 %1734 }
 0x373   : > { %v1729_v28 = vmax.f32 %v3534_v11, %v1727_v26 }
 0x37a   : > { %v1731_v29 = vpop.permute.xlu0 %1730 }
 0x37b   : > { %v1733_v30 = vmax.f32 %v1729_v28, %v1731_v29 }
 0x37d   : > { %v3550_v33 = vmax.f32 %v1733_v30, %v1735_v31 }
 0x37f   : > { %1754 = vrot.lane.b32.xlu2 %v3550_v33, %s3099_s22  ;;  %1743 = vrot.lane.b32.xlu1 %v3550_v33, %s3098_s19  ;;  %v1738_v6 = vsub.f32 %v3534_v11, %v3550_v33 }
 0x381   : > { %v1739_v9 = vmul.f32 1.442695, %v1738_v6 }
 0x382   : > { %v3567_v46 = vpop.permute.xlu0 %1824 }
 0x383   : > { %v1827_v47 = vsub.f32 %v3470_v20, %v3567_v46 }
 0x387   : > { %1765 = vrot.lane.b32.xlu2 %v3550_v33, %s3100_s14  ;;  %1828 = vrot.lane.b32.xlu1 %v2618_v34, %s3095_s16 }
 0x38a   : > { %v1901_v62 = vpop.permute.xlu0 %1900 }
 0x38b   : > { %v1903_v63 = vsub.f32 %v3470_v20, %v1901_v62 }
 0x38f   : > { %1864 = vrot.lane.b32.xlu2 %v2618_v34, %s3101_s23  ;;  %1904 = vrot.lane.b32.xlu1 %v2618_v34, %s3100_s14 }
 0x3d9   : > { %v1755_v35 = vpop.permute.xlu2 %1754 }
 0x3da   : > { %v1757_v36 = vsub.f32 %v3534_v11, %v1755_v35 }
 0x3dc   : > { %v1758_v37 = vmul.f32 1.442695, %v1757_v36 }
 0x3de   : > { %2619 = vpow2.f32 %v1758_v37 }
 0x3e1   : > { %v1766_v38 = vpop.permute.xlu2 %1765 }
 0x3e2   : > { %v1768_v39 = vsub.f32 %v3534_v11, %v1766_v38 }
 0x3e4   : > { %v2620_v40 = vpop.eup %2619  ;;  %v1769_v41 = vmul.f32 1.442695, %v1768_v39 }
 0x3e5   : > { %1761 = vrot.lane.b32.xlu0 %v2620_v40, %s3097_s30 }
 0x3e6   : > { %2621 = vpow2.f32 %v1769_v41 }
 0x3e9   : > { %v1865_v0 = vpop.permute.xlu2 %1864 }
 0x3ea   : > { %v1867_v3 = vmul.f32 %v1865_v0, %v1863_v1 }
 0x3ec   : > { %v2622_v42 = vpop.eup %2621  ;;  %v1868_v5 = vsub.f32 0.0, %v1867_v3 }
 0x3ed   : > { %1788 = vrot.lane.b32.xlu0 %v2618_v34, %s3097_s30  ;;  %1772 = vrot.lane.b32.xlu1 %v2622_v42, %s3095_s16 }
 0x3ee   : > { %v1870_v8 = vand.u32 2147483647, %v1868_v5 }
 0x3f0   : > { %v1871_v12 = vsub.f32 0.0, %v1870_v8 }
 0x3f1   : > { %v1744_v43 = vpop.permute.xlu1 %1743 }
 0x3f2   : > { %v1746_v44 = vsub.f32 %v3534_v11, %v1744_v43  ;;  %v1872_v14 = vmul.f32 1.442695, %v1871_v12 }
 0x3f4   : > { %v1747_v45 = vmul.f32 1.442695, %v1746_v44 }
 0x3f6   : > { %2623 = vpow2.f32 %v1747_v45  ;;  %v1869_v45 = vmax.f32 %v1868_v5, 0.0 }
 0x3f9   : > { %v1829_v49 = vpop.permute.xlu1 %1828 }
 0x3fa   : > { %v3571_v50 = vmul.f32 %v1829_v49, %v1827_v47 }
 0x3fc   : > { %v2624_v51 = vpop.eup %2623  ;;  %v1832_v52 = vsub.f32 0.0, %v3571_v50 }
 0x3fd   : > { %1750 = vrot.lane.b32.xlu2 %v2624_v51, %s3096_s11 }
 0x3fe   : > { %v1834_v53 = vand.u32 2147483647, %v1832_v52  ;;  %v1833_v59 = vmax.f32 %v1832_v52, 0.0 }
 0x400   : > { %v1835_v54 = vsub.f32 0.0, %v1834_v53 }
 0x401   : > { %v1905_v48 = vpop.permute.xlu1 %1904 }
 0x402   : > { %v1836_v55 = vmul.f32 1.442695, %v1835_v54  ;;  %v3584_v2 = vmul.f32 %v1905_v48, %v1903_v63 }
 0x404   : > { %2625 = vpow2.f32 %v1836_v55  ;;  %v1908_v4 = vsub.f32 0.0, %v3584_v2 }
 0x405   : > { %1780 = vrot.lane.b32.xlu2 %v3534_v11, %s3099_s22 }
 0x406   : > { %v1910_v7 = vand.u32 2147483647, %v1908_v4  ;;  %v1909_v44 = vmax.f32 %v1908_v4, 0.0 }
 0x408   : > { %v1911_v10 = vsub.f32 0.0, %v1910_v7 }
 0x40a   : > { %v2626_v56 = vpop.eup %2625  ;;  %v1912_v13 = vmul.f32 1.442695, %v1911_v10 }
 0x40b   : > { %v1838_v57 = vadd.f32 1.0, %v2626_v56 }
 0x40d   : > { %2627 = vlog2.f32 %v1838_v57 }
 0x40e   : > { %2629 = vpow2.f32 %v1739_v9 }
 0x40f   : > { %2631 = vpow2.f32 %v1912_v13 }
 0x410   : > { %2633 = vpow2.f32 %v1872_v14 }
 0x413   : > { %v2628_v58 = vpop.eup %2627 }
 0x414   : > { %v1840_v60 = vmul.f32 0.6931472, %v2628_v58  ;;  %v2630_v17 = vpop.eup %2629 }
 0x415   : > { %v2632_v21 = vpop.eup %2631 }
 0x416   : > { %v3577_v61 = vadd.f32 %v1840_v60, %v1833_v59  ;;  %v2634_v24 = vpop.eup %2633  ;;  %v1914_v29 = vadd.f32 1.0, %v2632_v21 }
 0x417   : > { %v1874_v31 = vadd.f32 1.0, %v2634_v24 }
 0x418   : > { %1843 = vrot.lane.b32.xlu2 %v3577_v61, %s3100_s14  ;;  %v1853_v53 = vmul.f32 2.0, %v3577_v61 }
 0x457   : > { %v1751_v15 = vpop.permute.xlu2 %1750  ;;  %v1762_v16 = vpop.permute.xlu0 %1761 }
 0x458   : > { %v1753_v18 = vadd.f32 %v2630_v17, %v1751_v15 }
 0x45a   : > { %v1764_v19 = vadd.f32 %v1762_v16, %v1753_v18 }
 0x45f   : > { %v1781_v22 = vpop.permute.xlu2 %1780  ;;  %v1773_v23 = vpop.permute.xlu1 %1772 }
 0x460   : > { %v1783_v26 = vsub.f32 %v3470_v20, %v1781_v22  ;;  %v1775_v27 = vadd.f32 %v1773_v23, %v1764_v19  ;;  %v1789_v28 = vpop.permute.xlu0 %1788 }
 0x462   : > { %2635 = vlog2.f32 %v1775_v27  ;;  %v1791_v30 = vmul.f32 %v1789_v28, %v1783_v26 }
 0x463   : > { %2637 = vlog2.f32 %v1914_v29 }
 0x464   : > { %v1792_v32 = vsub.f32 0.0, %v1791_v30  ;;  %2639 = vlog2.f32 %v1874_v31 }
 0x466   : > { %v1794_v34 = vand.u32 2147483647, %v1792_v32  ;;  %v1793_v57 = vmax.f32 %v1792_v32, 0.0 }
 0x468   : > { %v2636_v35 = vpop.eup %2635  ;;  %v1795_v37 = vsub.f32 0.0, %v1794_v34 }
 0x469   : > { %v1777_v36 = vmul.f32 0.6931472, %v2636_v35  ;;  %v2638_v39 = vpop.eup %2637 }
 0x46a   : > { %v2640_v40 = vpop.eup %2639  ;;  %v1796_v41 = vmul.f32 1.442695, %v1795_v37  ;;  %v1916_v42 = vmul.f32 0.6931472, %v2638_v39 }
 0x46b   : > { %v3591_v38 = vadd.f32 %v1777_v36, %v3550_v33  ;;  %v1876_v43 = vmul.f32 0.6931472, %v2640_v40 }
 0x46c   : > { %2641 = vpow2.f32 %v1796_v41  ;;  %v1917_v47 = vadd.f32 %v1916_v42, %v1909_v44 }
 0x46d   : > { %1895 = vrot.lane.b32.xlu2 %v3591_v38, %s3100_s14  ;;  %1859 = vrot.lane.b32.xlu0 %v3591_v38, %s3099_s22  ;;  %v1877_v33 = vadd.f32 %v1876_v43, %v1869_v45  ;;  %v1779_v26 = vsub.f32 %v3534_v11, %v3591_v38 }
 0x46e   : > { %1820 = vrot.lane.b32.xlu1 %v3591_v38, %s3098_s19  ;;  %v1929_v54 = vmul.f32 2.0, %v1917_v47 }
 0x46f   : > { %v1889_v52 = vmul.f32 2.0, %v1877_v33 }
 0x472   : > { %v2642_v49 = vpop.eup %2641  ;;  %v1844_v59 = vpop.permute.xlu2 %1843 }
 0x473   : > { %v1798_v51 = vadd.f32 1.0, %v2642_v49 }
 0x475   : > { %1884 = vrot.lane.b32.xlu2 %v1867_v3, %s3101_s23  ;;  %1919 = vrot.lane.b32.xlu0 %v1917_v47, %s3095_s16  ;;  %2643 = vlog2.f32 %v1798_v51 }
 0x476   : > { %1879 = vrot.lane.b32.xlu1 %v1877_v33, %s3101_s23 }
 0x47b   : > { %v2644_v55 = vpop.eup %2643 }
 0x47c   : > { %v1800_v56 = vmul.f32 0.6931472, %v2644_v55 }
 0x47d   : > { %1891 = vrot.lane.b32.xlu2 %v1889_v52, %s3101_s23  ;;  %1855 = vrot.lane.b32.xlu0 %v1853_v53, %s3100_s14 }
 0x47e   : > { %1848 = vrot.lane.b32.xlu1 %v3571_v50, %s3100_s14  ;;  %v1801_v58 = vadd.f32 %v1800_v56, %v1793_v57 }
 0x480   : > { %v1813_v10 = vmul.f32 2.0, %v1801_v58 }
 0x485   : > { %1931 = vrot.lane.b32.xlu0 %v1929_v54, %s3095_s16 }
 0x486   : > { %1924 = vrot.lane.b32.xlu1 %v3584_v2, %s3095_s16 }
 0x48e   : > { %1803 = vrot.lane.b32.xlu1 %v1801_v58, %s3099_s22 }
 0x4c7   : > { %v1896_v60 = vpop.permute.xlu2 %1895 }
 0x4c8   : > { %v1898_v63 = vsub.f32 %v3534_v11, %v1896_v60 }
 0x4cf   : > { %v1885_v2 = vpop.permute.xlu2 %1884 }
 0x4d7   : > { %v1892_v12 = vpop.permute.xlu2 %1891 }
 0x4df   : > { %v1860_v61 = vpop.permute.xlu0 %1859 }
 0x4e0   : > { %v1821_v62 = vpop.permute.xlu1 %1820  ;;  %v1862_v0 = vsub.f32 %v3534_v11, %v1860_v61 }
 0x4e1   : > { %v1823_v48 = vsub.f32 %v3534_v11, %v1821_v62 }
 0x4e2   : > { %v1887_v6 = vsub.f32 %v1862_v0, %v1885_v2 }
 0x4e3   : > { %v3612_v50 = vsub.f32 %v1823_v48, %v1844_v59 }
 0x4e4   : > { %v1888_v7 = vsub.f32 %v1887_v6, %v3544_v25 }
 0x4e5   : > { %1936 = vrot.lane.b32.xlu2 %v3612_v50, %s3096_s11 }
 0x4e6   : > { %v1894_v15 = vsub.f32 %v1888_v7, %v1892_v12 }
 0x4e7   : > { %v1920_v1 = vpop.permute.xlu0 %1919 }
 0x4e8   : > { %v1880_v3 = vpop.permute.xlu1 %1879  ;;  %v3618_v4 = vsub.f32 %v1898_v63, %v1920_v1 }
 0x4e9   : > { %v1882_v5 = vsub.f32 %v1862_v0, %v1880_v3 }
 0x4ea   : > { %1946 = vrot.lane.b32.xlu1 %v3618_v4, %s3095_s16 }
 0x4eb   : > { %1941 = vrot.lane.b32.xlu0 %v1882_v5, %s3097_s30 }
 0x4ed   : > { %1808 = vrot.lane.b32.xlu2 %v1791_v30, %s3099_s22 }
 0x4ef   : > { %v1856_v13 = vpop.permute.xlu0 %1855 }
 0x4f0   : > { %v1849_v8 = vpop.permute.xlu1 %1848 }
 0x4f1   : > { %v1851_v9 = vsub.f32 %v1823_v48, %v1849_v8 }
 0x4f3   : > { %v1852_v14 = vsub.f32 %v1851_v9, %v3544_v25  ;;  %1815 = vrot.lane.b32.xlu0 %v1813_v10, %s3099_s22 }
 0x4f5   : > { %v3627_v16 = vsub.f32 %v1852_v14, %v1856_v13  ;;  %1997 = vrot.lane.b32.xlu2 %v1894_v15, %s3097_s30 }
 0x4f7   : > { %1992 = vrot.lane.b32.xlu1 %v3627_v16, %s3096_s11  ;;  %v1932_v21 = vpop.permute.xlu0 %1931 }
 0x4f8   : > { %v1925_v17 = vpop.permute.xlu1 %1924 }
 0x4f9   : > { %v1927_v18 = vsub.f32 %v1898_v63, %v1925_v17 }
 0x4fb   : > { %v1928_v19 = vsub.f32 %v1927_v18, %v3544_v25 }
 0x4fd   : > { %v1934_v22 = vsub.f32 %v1928_v19, %v1932_v21 }
 0x4ff   : > { %2002 = vrot.lane.b32.xlu0 %v1934_v22, %s3095_s16 }
 0x500   : > { %v1804_v23 = vpop.permute.xlu1 %1803 }
 0x501   : > { %v3636_v27 = vsub.f32 %v1779_v26, %v1804_v23 }
 0x53f   : > { %v1937_v24 = vpop.permute.xlu2 %1936 }
 0x540   : > { %v1939_v28 = vmax.f32 %v3636_v27, %v1937_v24 }
 0x547   : > { %v1809_v34 = vpop.permute.xlu2 %1808 }
 0x548   : > { %v1811_v35 = vsub.f32 %v1779_v26, %v1809_v34 }
 0x54a   : > { %v1812_v37 = vsub.f32 %v1811_v35, %v3544_v25 }
 0x54f   : > { %v1998_v41 = vpop.permute.xlu2 %1997 }
 0x55c   : > { %v1947_v31 = vpop.permute.xlu1 %1946 }
 0x55d   : > { %v1942_v29 = vpop.permute.xlu0 %1941 }
 0x55e   : > { %v1944_v30 = vmax.f32 %v1939_v28, %v1942_v29 }
 0x560   : > { %v3639_v32 = vmax.f32 %v1944_v30, %v1947_v31 }
 0x562   : > { %1977 = vrot.lane.b32.xlu0 %v3639_v32, %s3100_s14  ;;  %1966 = vrot.lane.b32.xlu2 %v3639_v32, %s3099_s22  ;;  %v1950_v6 = vsub.f32 %v3636_v27, %v3639_v32 }
 0x563   : > { %1955 = vrot.lane.b32.xlu1 %v3639_v32, %s3098_s19 }
 0x564   : > { %v1951_v7 = vmul.f32 1.442695, %v1950_v6 }
 0x565   : > { %v1816_v36 = vpop.permute.xlu0 %1815 }
 0x566   : > { %v3648_v39 = vsub.f32 %v1812_v37, %v1816_v36 }
 0x569   : > { %v1993_v38 = vpop.permute.xlu1 %1992 }
 0x56a   : > { %v1995_v40 = vmax.f32 %v3648_v39, %v1993_v38 }
 0x56c   : > { %v2000_v42 = vmax.f32 %v1995_v40, %v1998_v41 }
 0x571   : > { %v2003_v43 = vpop.permute.xlu0 %2002 }
 0x572   : > { %v3651_v44 = vmax.f32 %v2000_v42, %v2003_v43 }
 0x574   : > { %2033 = vrot.lane.b32.xlu0 %v3651_v44, %s3100_s14  ;;  %2022 = vrot.lane.b32.xlu2 %v3651_v44, %s3099_s22 }
 0x575   : > { %2011 = vrot.lane.b32.xlu1 %v3651_v44, %s3098_s19 }
 0x5bc   : > { %v1967_v25 = vpop.permute.xlu2 %1966 }
 0x5bd   : > { %v1969_v45 = vsub.f32 %v1882_v5, %v1967_v25 }
 0x5bf   : > { %v1970_v47 = vmul.f32 1.442695, %v1969_v45 }
 0x5c1   : > { %2645 = vpow2.f32 %v1970_v47 }
 0x5c2   : > { %2647 = vtanh.f32 %v3534_v11 }
 0x5c7   : > { %v2646_v33 = vpop.eup %2645 }
 0x5c8   : > { %1973 = vrot.lane.b32.xlu2 %v2646_v33, %s3097_s30  ;;  %v2648_v53 = vpop.eup %2647 }
 0x5c9   : > { %v2075_v59 = vmul.f32 1.442695, %v2648_v53 }
 0x5ce   : > { %v2023_v49 = vpop.permute.xlu2 %2022 }
 0x5cf   : > { %v2025_v51 = vsub.f32 %v1894_v15, %v2023_v49  ;;  %v2006_v15 = vsub.f32 %v3648_v39, %v3651_v44 }
 0x5d1   : > { %v2026_v52 = vmul.f32 1.442695, %v2025_v51  ;;  %v2007_v17 = vmul.f32 1.442695, %v2006_v15 }
 0x5d3   : > { %2649 = vpow2.f32 %v2026_v52 }
 0x5d4   : > { %v1978_v54 = vpop.permute.xlu0 %1977 }
 0x5d5   : > { %v1956_v55 = vpop.permute.xlu1 %1955  ;;  %v1980_v56 = vsub.f32 %v3618_v4, %v1978_v54 }
 0x5d6   : > { %v1958_v57 = vsub.f32 %v3612_v50, %v1956_v55 }
 0x5d7   : > { %v1981_v58 = vmul.f32 1.442695, %v1980_v56 }
 0x5d8   : > { %v1959_v60 = vmul.f32 1.442695, %v1958_v57 }
 0x5d9   : > { %v2650_v61 = vpop.eup %2649  ;;  %2651 = vpow2.f32 %v1981_v58 }
 0x5da   : > { %2653 = vpow2.f32 %v1959_v60  ;;  %2029 = vrot.lane.b32.xlu2 %v2650_v61, %s3097_s30 }
 0x5db   : > { %2655 = vpow2.f32 %v2075_v59 }
 0x5df   : > { %v2652_v11 = vpop.eup %2651 }
 0x5e0   : > { %v2654_v62 = vpop.eup %2653  ;;  %1984 = vrot.lane.b32.xlu0 %v2652_v11, %s3095_s16 }
 0x5e1   : > { %v2656_v48 = vpop.eup %2655  ;;  %1962 = vrot.lane.b32.xlu1 %v2654_v62, %s3096_s11 }
 0x5e2   : > { %2078 = vrot.lane.b32.xlu2 %v2656_v48, %s3099_s22  ;;  %v2616_v48 = vld [vmem:[%s3820_s0] ss:$0 sm:$0xff] }
 0x5e3   : > { %vm2094_vm12 = vcmp.gt.f32.partialorder %v2616_v48, 0.5 }
 0x5e6   : > { %v2034_v63 = vpop.permute.xlu0 %2033 }
 0x5e7   : > { %v2012_v50 = vpop.permute.xlu1 %2011  ;;  %v2036_v0 = vsub.f32 %v1934_v22, %v2034_v63 }
 0x5e8   : > { %v2014_v1 = vsub.f32 %v3627_v16, %v2012_v50 }
 0x5e9   : > { %v2037_v2 = vmul.f32 1.442695, %v2036_v0 }
 0x5ea   : > { %v2015_v3 = vmul.f32 1.442695, %v2014_v1 }
 0x5eb   : > { %2657 = vpow2.f32 %v2037_v2 }
 0x5ec   : > { %2659 = vpow2.f32 %v2015_v3  ;;  %v2100_v3 = vld [vmem:[#allocation3] sm:$0xff] }
 0x5ed   : > { %2661 = vpow2.f32 %v1951_v7 }
 0x5f1   : > { %v2658_v4 = vpop.eup %2657 }
 0x5f2   : > { %v2660_v5 = vpop.eup %2659  ;;  %2040 = vrot.lane.b32.xlu0 %v2658_v4, %s3095_s16 }
 0x5f3   : > { %2018 = vrot.lane.b32.xlu1 %v2660_v5, %s3096_s11  ;;  %v2662_v8 = vpop.eup %2661 }
 0x5fb   : > { %2084 = vrot.lane.b32.xlu1 %v2648_v53, %s3099_s22 }
 0x622   : > { %v1974_v12 = vpop.permute.xlu2 %1973 }
 0x634   : > { %v2030_v27 = vpop.permute.xlu2 %2029 }
 0x63c   : > { %v2079_v61 = vpop.permute.xlu2 %2078 }
 0x652   : > { %v1985_v14 = vpop.permute.xlu0 %1984 }
 0x653   : > { %v1963_v9 = vpop.permute.xlu1 %1962 }
 0x654   : > { %v1965_v10 = vadd.f32 %v2662_v8, %v1963_v9 }
 0x656   : > { %v1976_v13 = vadd.f32 %v1974_v12, %v1965_v10 }
 0x658   : > { %v1987_v16 = vadd.f32 %v1985_v14, %v1976_v13 }
 0x65a   : > { %2663 = vlog2.f32 %v1987_v16 }
 0x65b   : > { %2665 = vpow2.f32 %v2007_v17 }
 0x660   : > { %v2664_v18 = vpop.eup %2663 }
 0x661   : > { %v1989_v19 = vmul.f32 0.6931472, %v2664_v18  ;;  %v2666_v22 = vpop.eup %2665 }
 0x663   : > { %v1990_v21 = vadd.f32 %v1989_v19, %v3639_v32 }
 0x664   : > { %v2041_v29 = vpop.permute.xlu0 %2040 }
 0x665   : > { %v2047_v23 = vmul.f32 1.442695, %v1990_v21  ;;  %v2019_v24 = vpop.permute.xlu1 %2018 }
 0x666   : > { %v2021_v26 = vadd.f32 %v2666_v22, %v2019_v24 }
 0x667   : > { %2667 = vpow2.f32 %v2047_v23 }
 0x668   : > { %v2032_v28 = vadd.f32 %v2030_v27, %v2021_v26 }
 0x66a   : > { %v2043_v30 = vadd.f32 %v2041_v29, %v2032_v28 }
 0x66c   : > { %2669 = vlog2.f32 %v2043_v30 }
 0x66d   : > { %v2668_v31 = vpop.eup %2667  ;;  %v2085_v25 = vpop.permute.xlu1 %2084 }
 0x66e   : > { %2671 = vlog2.f32 %v2668_v31  ;;  %v2071_v34 = vsub.f32 1.0, %v2668_v31  ;;  %v2060_v49 = vand.u32 2147483648, %v2668_v31  ;;  %v2058_v52 = vand.u32 2147483647, %v2668_v31 }
 0x66f   : > { %2673 = vrcp.f32 %v2668_v31  ;;  %vm2054_vm9 = vweird.f32 %v2668_v31 }
 0x670   : > { %2675 = vlog2.f32 %v2071_v34  ;;  %vm2059_vm11 = vcmp.eq.f32.partialorder %v2058_v52, 8.507059e+37 }
 0x672   : > { %v2670_v35 = vpop.eup %2669 }
 0x673   : > { %v2045_v36 = vmul.f32 0.6931472, %v2670_v35 }
 0x674   : > { %v2672_v37 = vpop.eup %2671 }
 0x675   : > { %v2674_v38 = vpop.eup %2673  ;;  %v2046_v32 = vadd.f32 %v2045_v36, %v3651_v44  ;;  %v2069_v39 = vmul.f32 0.6931472, %v2672_v37  ;;  %v2061_v44 = vor.u32 1.1754944e-38, %v2060_v49 }
 0x676   : > { %v2676_v40 = vpop.eup %2675  ;;  %v2050_v41 = vmul.f32 %v2674_v38, %v2668_v31  ;;  %vm2055_vm8 = vweird.f32 %v2674_v38 }
 0x677   : > { %v2070_v42 = vsub.f32 0.0, %v2069_v39  ;;  %v2073_v43 = vmul.f32 0.6931472, %v2676_v40  ;;  %v2087_v33 = vadd.f32 %v2085_v25, %v2046_v32  ;;  %vm2056_vm10 = vmor %vm2054_vm9, %vm2055_vm8 }
 0x678   : > { %v2051_v45 = vsub.f32 1.0, %v2050_v41 }
 0x679   : > { %v2074_v47 = vsub.f32 %v2070_v42, %v2073_v43 }
 0x67a   : > { %v2052_v51 = vmul.f32 %v2674_v38, %v2051_v45 }
 0x67b   : > { %v2088_v53 = vadd.f32 %v2087_v33, %v2074_v47 }
 0x67c   : > { %v2053_v54 = vadd.f32 %v2674_v38, %v2052_v51 }
 0x67d   : > { %2102 = vrot.lane.b32.xlu0 %v2088_v53, %s3097_s30 }
 0x67e   : > { %v2057_v55 = vsel %vm2056_vm10, %v2674_v38, %v2053_v54 }
 0x67f   : > { %v2062_v56 = vsel %vm2059_vm11, %v2061_v44, %v2057_v55 }
 0x680   : > { %v2447_v57 = vadd.f32 -1.0, %v2062_v56 }
 0x682   : > { %2677 = vlog2.f32 %v2447_v57 }
 0x688   : > { %v2678_v58 = vpop.eup %2677 }
 0x689   : > { %v2066_v59 = vmul.f32 0.6931472, %v2678_v58 }
 0x68b   : > { %v2067_v60 = vsub.f32 0.0, %v2066_v59 }
 0x68d   : > { %v2081_v11 = vmul.f32 %v2079_v61, %v2067_v60 }
 0x68f   : > { %v2082_v62 = vadd.f32 %v2081_v11, %v3567_v46 }
 0x691   : > { %2096 = vrot.lane.b32.xlu2 %v2082_v62, %s3097_s30 }
 0x6eb   : > { %v2097_v63 = vpop.permute.xlu2 %2096 }
 0x6ec   : > { %v2099_v50 = vsel %vm2094_vm12, %v2097_v63, %v3470_v20 }
 0x6ed   : > { %2110 = vst.msk [vmem:[#allocation2] sm:$0xff] %vm768_vm3, %v2099_v50 }
 0x6ef   : > { %v2103_v0 = vpop.permute.xlu0 %2102 }
 0x6f0   : > { %v2105_v1 = vsel %vm2094_vm12, %v2103_v0, 0.0 }
 0x6f1   : > { %v2106_v2 = vsel %vm768_vm3, %v2105_v1, 0.0 }
 0x6f2   : > { %2107 = vadd.xlane.f32.xlu1 %v2106_v2 }
 0x764   : > { %2116 = sbr.rel (%p2448_p11) target bundleno = 1899 (0x76b), region = 104 }
 0x765   : > { %v2108_v4 = vpop.xlane.xlu1 %2107 }
 0x766   : > { %v2109_v5 = vadd.f32 %v2108_v4, %v2100_v3 }
 0x768   : > { %2112 = vst.msk [vmem:[#allocation3] sm:$0xff] %vm2111_vm13, %v2109_v5 }
 0x769   : > { %2117 = vst.msk [vmem:[%s3460_s28] sm:$0xff] %vm768_vm3, %v2099_v50 }
 0x76a   : > { %2118 = vst.msk [vmem:[%s3454_s7] sm:$0xff] %vm2111_vm13, %v2109_v5 }
 0x76b PF: > { %s3822_s10 = sld [smem:[#allocation29_spill]]  ;;  %s2136_s3 = sshll.u32 %s3460_s28, 4  ;;  %s2137_s3 = int_to_ptr.vmem [resolvable:$true] %s2136_s3 }
 0x76c   : > { %s3823_s4 = sld [smem:[#allocation45_spill]]  ;;  %s2120_s17 = scalar_lea.sflag [#allocation6], %s3397_s1 }
 0x771   : > { %s2450_s29 = sshll.u32 %s3822_s10, 3 }
 0x772   : > { %s2134_s26 = scalar_lea.hbm %s3823_s4, %s2450_s29  ;;  %s2969_s11 = scalar_lea.hbm %s3823_s4, 16 }
 0x773   : > { %s2138_s13 = sshll.u32 %s2134_s26, 4  ;;  %s2139_s13 = int_to_ptr.hbm [resolvable:$true] %s2138_s13 }
 0x774   : > { %s2963_s12 = sshra.s32 %s2139_s13, 4  ;;  %s2964_s12 = int_to_ptr.hbm [resolvable:$true] %s2963_s12 }
 0x775   : > { %s2965_s2 = scalar_lea.hbm %s2964_s12, 8  ;;  %p2970_p5 = scmp.lt.s32.totalorder %s2964_s12, %s3823_s4 }
 0x776   : > { %p2966_p1 = scmp.ne.s32.totalorder %s2964_s12, %s2965_s2  ;;  %p2971_p6 = scmp.lt.s32.totalorder %s2969_s11, %s2965_s2 }
 0x778   : > { %p2967_p3 = pnand %p2966_p1, %p3339_p12  ;;  %p2972_p8 = por %p2971_p6, %p2970_p5 }
 0x77a   : > { %p2968_p0 = pneg %p2967_p3 }
 0x77c   : > { %p2973_p9 = pnand %p2972_p8, %p2968_p0 }
 0x77e   : > { %2976 = shalt.err (!%p2973_p9)
}
 0x77f   : > { %2474 = dma.vmem_to_hbm [thread:$0]  (%p3339_p12), %s2137_s3, 128, %s2139_s13, %s2120_s17  }
 0x780 PF: > { %p2509_p2 = scmp.ge.s32.totalorder %s3087_s27, 2  ;;  %s2153_s28 = sand.u32 1, %s3059_s20  }
 0x781   : > { %s2154_s22 = scalar_lea.sflag [#allocation6], %s2153_s28 }
 0x782   : > { %p2505_p4 = pnand %p2509_p2, %p3348_p13 }
 0x784   : > { %p2506_p7 = pneg %p2505_p4 }
 0x786   : > { %3042 = dma.done.wait (%p2506_p7), %s2154_s22, 128  }
 0x787   : > { %3044 = vsyncadd (%p2506_p7), %s2154_s22, 4294967168  ;;  %s40_s27 = sadd.s32 1, %s3087_s27   ;;  %s3825_s14 = sld [smem:[#allocation26_spill]] }
 0x788   : > { %p37_p10 = scmp.ge.s32.totalorder %s40_s27, 10   ;;  %s3826_s19 = sld [smem:[#allocation34_spill]] }
 0x789   : > { %s3827_s5 = sld [smem:[#allocation27_spill]]  ;;  %s3832_s17 = smov %s3051_s18 }
 0x78a   : > { %s3828_s22 = sld [smem:[#allocation35_spill]]  ;;  %s3834_s20 = smov %s3063_s21 }
 0x78b   : > { %s3829_s24 = sld [smem:[#allocation30_spill]]  ;;  %s3836_s23 = smov %s3079_s25 }
 0x78c   : > { %s3830_s0 = sld [smem:[#allocation32_spill]] }
 0x78d   : > { %s3831_s26 = sld [smem:[#allocation33_spill]]  ;;  %s3833_s18 = smov %s3825_s14 }
 0x78e   :  { %39 = sbr.rel (!%p37_p10) target bundleno = 28 (0x1c), region = 226 }
 0x78f   : > { %s3835_s21 = smov %s3827_s5 }
 0x792   : > { %s3837_s25 = smov %s3830_s0 }
 0x793   :  { %2167 = vsyncpa [#allocation5], 1 }
 0x794   :  { %2169 = vsyncpa [#allocation5 + $0x1], 1 }
 0x795   :  { %2170 = vsyncpa [#allocation8], 1 }
 0x796   :  { %2172 = vsyncpa [#allocation8 + $0x1], 1 }
 0x797   :  { %2173 = vsyncpa [#allocation11], 1 }
 0x798   :  { %2175 = vsyncpa [#allocation11 + $0x1], 1 }
 0x799   :  { %2176 = vsyncpa [#allocation14], 1 }
 0x79a   :  { %2178 = vsyncpa [#allocation14 + $0x1], 1 }
 0x79b   :  { %2179 = vsyncpa [#allocation17], 1 }
 0x79c   :  { %2181 = vsyncpa [#allocation17 + $0x1], 1 }
 0x79d   :  { %2182 = vsyncpa [#allocation6], 1 }
 0x79e   :  { %2184 = vsyncpa [#allocation6 + $0x1], 1 }

</bundles_post_ra>
